<compile_context>
chip_gen: v6e
topology: v6e:2x2x1
jax: 0.10.0
libtpu: 0.0.40
codegen_flags: <defaults>
</compile_context>

<pallas_src>
import functools
import math

import numpy as np
import jax
import jax.numpy as jnp
from jax import lax
from jax.experimental import pallas as pl
from jax.experimental.pallas import tpu as pltpu

GROUPS = 4          # nn.GroupNorm(4, ...)
EPS = 1e-5          # PyTorch GroupNorm default eps
PREC_HI = jax.lax.Precision.HIGHEST
SMALL_K_MAX = 16    # <= this many per-image input channels -> exact-f32 VPU MAC path


# ---------------------------------------------------------------------------
# in-kernel helpers
# ---------------------------------------------------------------------------
def _erf(x):
    # nn.GELU (exact) needs erf; Abramowitz & Stegun 7.1.26 (max abs err ~1.5e-7).
    # The exp() lands on the EUP slot, nearly free next to the VPU work.
    a1, a2, a3, a4, a5 = 0.254829592, -0.284496736, 1.421413741, -1.453152027, 1.061405429
    p = 0.3275911
    sgn = jnp.where(x >= 0.0, 1.0, -1.0)
    ax = jnp.abs(x)
    t = 1.0 / (1.0 + p * ax)
    poly = ((((a5 * t + a4) * t + a3) * t + a2) * t + a1) * t
    return sgn * (1.0 - poly * jnp.exp(-ax * ax))


def _gelu_exact(x):
    return 0.5 * x * (1.0 + _erf(x * (1.0 / math.sqrt(2.0))))


def _tree_sum(terms):
    # Pairwise reduction: O(log K) dependent adds instead of a serial chain
    # (this kernel is latency-bound, not throughput-bound).
    while len(terms) > 1:
        nxt = [terms[i] + terms[i + 1] for i in range(0, len(terms) - 1, 2)]
        if len(terms) % 2:
            nxt.append(terms[-1])
        terms = nxt
    return terms[0]


def _conv1x1_bd(w, x, cin_per_image):
    """Batched 1x1 conv as a block-diagonal channel contraction.

    w: (M, K) batch-block-diagonal weight; x: (K, HW).
    Tiny per-image Cin: exact-f32 VPU broadcast-MACs with tree accumulation.
    Large Cin: MXU fallback (HIGHEST keeps f32 accuracy; DEFAULT would truncate
    the operands to bf16 on the MXU).
    """
    K = x.shape[0]
    if cin_per_image <= SMALL_K_MAX:
        terms = [w[:, c:c + 1] * x[c:c + 1, :] for c in range(K)]
        return _tree_sum(terms)
    # TODO(synk): re-measure the VPU/MXU crossover per TPU generation.
    return jnp.dot(w, x, precision=PREC_HI, preferred_element_type=jnp.float32)


def _group_sum(s, cpg):
    """s: (CT, 1) per-channel values.  Returns (CT, 1) where every channel holds
    the sum over its (aligned, size-cpg) group.  Pure VPU/XLU: sublane rolls +
    selects + adds -- no MXU round trip.  Group boundaries stay aligned under
    batch folding, and the select never picks an array-wraparound value."""
    ct = s.shape[0]
    if cpg == 1:
        return s
    pos = lax.broadcasted_iota(jnp.int32, (ct, 1), 0) % cpg
    out = s
    for k in range(1, cpg):
        hi = pltpu.roll(s, (ct - k) % ct, axis=0)   # hi[i] = s[i + k]
        lo = pltpu.roll(s, cpg - k, axis=0)         # lo[i] = s[i + k - cpg]
        out = out + jnp.where(pos + k < cpg, hi, lo)
    return out


def _group_norm(y, gamma, beta, cpg):
    """GroupNorm on a lane-dense (CT, HW) activation; groups are aligned blocks of
    cpg channel rows.  Two-pass (centered) variance for numerical robustness."""
    ct, hw = y.shape
    inv_n = 1.0 / float(cpg * hw)
    s = jnp.sum(y, axis=1, keepdims=True)            # (CT, 1) lane reduce
    mean = _group_sum(s, cpg) * inv_n
    d = y - mean
    ss = jnp.sum(d * d, axis=1, keepdims=True)       # centered sumsq
    var = _group_sum(ss, cpg) * inv_n
    scale = lax.rsqrt(var + EPS) * gamma             # fold inv*gamma on the tiny (CT,1)
    return d * scale + beta


def _dw3x3(x, wd, H, W):
    """Depthwise 3x3 conv (pad=1, stride=1) on the lane-dense (CT, H*W) layout.

    Every tap is a pltpu.roll (XLU) of a pre-masked source -- no padded copy and
    no concatenate temporaries:
      * left/right image borders: 2 source pre-masks shared by all dx=-1 / dx=+1
        taps (zero the last / first column of the source before rolling),
      * top/bottom borders + roll wrap-around: one destination mask applied to
        the summed dy=-1 tap row and one to the summed dy=+1 tap row.
    """
    ct, hw = x.shape
    lane = lax.broadcasted_iota(jnp.int32, (1, hw), 1)
    colw = lane % W
    x_l = x * (colw <= W - 2).astype(x.dtype)    # source for dx = -1 taps
    x_r = x * (colw >= 1).astype(x.dtype)        # source for dx = +1 taps
    src = {-1: x_l, 0: x, 1: x_r}

    def tap(dy, dx):
        k = (dy + 1) * 3 + (dx + 1)
        s = dy * W + dx                          # flat source offset
        v = src[dx]
        if s != 0:
            v = pltpu.roll(v, (-s) % hw, axis=1)  # v[:, i] = src[:, i + s] (cyclic)
        return wd[:, k:k + 1] * v

    top = tap(-1, -1) + tap(-1, 0) + tap(-1, 1)
    top = top * (lane >= W).astype(x.dtype)            # dest row 0 reads padded row -1
    mid = tap(0, -1) + tap(0, 0) + tap(0, 1)
    bot = tap(1, -1) + tap(1, 0) + tap(1, 1)
    bot = bot * (lane < hw - W).astype(x.dtype)         # dest row H-1 reads padded row H
    return (top + mid) + bot


# ---------------------------------------------------------------------------
# fused kernel: nb batch elements per grid step, everything stays on-chip
# ---------------------------------------------------------------------------
def _fused_kernel(p_ref, x_ref, o_ref, *, H, W, nb, cin, chid, cout,
                  c_dw, c_w3, c_vec, use_shortcut):
    ki, kh, ko = nb * cin, nb * chid, nb * cout
    x = x_ref[...]                                     # (ki, HW)
    prm = p_ref[...]                                   # (R, P) packed parameter slab

    # unpack the parameter slab (static slices of a single tiny tile)
    w1 = prm[0:kh, 0:ki]                               # block-diag (kh, ki)
    wd = prm[0:kh, c_dw:c_dw + 9]                      # (kh, 9) depthwise taps
    w3 = prm[0:ko, c_w3:c_w3 + kh]                     # block-diag (ko, kh)
    g1 = prm[0:kh, c_vec + 0:c_vec + 1]
    b1 = prm[0:kh, c_vec + 1:c_vec + 2]
    g2 = prm[0:kh, c_vec + 2:c_vec + 3]
    b2 = prm[0:kh, c_vec + 3:c_vec + 4]
    g3 = prm[0:ko, c_vec + 4:c_vec + 5]
    b3 = prm[0:ko, c_vec + 5:c_vec + 6]

    cpg_h = chid // GROUPS
    cpg_o = cout // GROUPS

    # stage 1: 1x1 expand conv -> GN(4) -> GELU
    # TODO(synk): a stride-0 sublane-broadcast vld of the x rows could replace the
    #             implicit XLU broadcasts here if it ever shows up in the bundle.
    h = _conv1x1_bd(w1, x, cin)                        # (kh, HW)
    h = _gelu_exact(_group_norm(h, g1, b1, cpg_h))

    # stage 2: depthwise 3x3 (pad=1) -> GN(4) -> GELU (lane-dense, roll-based)
    h = _dw3x3(h, wd, H, W)
    h = _gelu_exact(_group_norm(h, g2, b2, cpg_h))

    # stage 3: 1x1 project conv -> GN(4) -> (+ shortcut, compile-time flag)
    y = _conv1x1_bd(w3, h, chid)                       # (ko, HW)
    y = _group_norm(y, g3, b3, cpg_o)
    if use_shortcut:
        y = y + x
    o_ref[...] = y


# ---------------------------------------------------------------------------
# wrapper (glue: batch folding, parameter packing, reshapes)
# ---------------------------------------------------------------------------
def _pick_batch_fold(n, cin, cout, chid, hw):
    """Smallest divisor of n whose folded input/output blocks fill full 8-sublane
    tiles and stay well under VMEM; fall back to folding everything (block ==
    full array is always a legal BlockSpec)."""
    budget = 8 * 1024 * 1024                       # rough live-activation budget / step
    per_img = (cin + cout + 2 * chid) * hw * 4
    for d in range(1, n + 1):
        if n % d:
            continue
        if (d * cin) % 8 == 0 and (d * cout) % 8 == 0 and d * per_img <= budget:
            return d
    return n


def inverted_depthwise_conv2d(x, params, *, stride=1):
    w1, g1, b1, wdw, g2, b2, w3, g3, b3 = params
    N, Cin, H, W = x.shape
    Chid = w1.shape[0]
    Cout = w3.shape[0]
    assert stride == 1  # TODO(synk): strided depthwise path not needed for this config
    use_shortcut = (stride == 1) and (Cin == Cout)
    HW = H * W

    nb = _pick_batch_fold(N, Cin, Cout, Chid, HW)
    ki, kh, ko = nb * Cin, nb * Chid, nb * Cout
    R = max(kh, ko)

    # ---- pack every parameter into one (R, P) slab: one DMA instead of nine ----
    eye = jnp.eye(nb, dtype=jnp.float32)

    def bd(w):                                     # per-image weight -> block-diagonal
        return jnp.kron(eye, w.astype(jnp.float32))

    def padr(a):                                   # zero-pad rows to R
        return jnp.pad(a, ((0, R - a.shape[0]), (0, 0)))

    def tile_vec(v, c):                            # (C,) -> (nb*C, 1)
        return jnp.tile(v.reshape(c, 1).astype(jnp.float32), (nb, 1))

    w1_bd = bd(w1)                                                     # (kh, ki)
    w3_bd = bd(w3)                                                     # (ko, kh)
    wd_t = jnp.tile(wdw.reshape(Chid, 9).astype(jnp.float32), (nb, 1))  # (kh, 9)
    c_dw = ki
    c_w3 = ki + 9
    c_vec = ki + 9 + kh
    slab = jnp.concatenate(
        [padr(w1_bd), padr(wd_t), padr(w3_bd),
         padr(tile_vec(g1, Chid)), padr(tile_vec(b1, Chid)),
         padr(tile_vec(g2, Chid)), padr(tile_vec(b2, Chid)),
         padr(tile_vec(g3, Cout)), padr(tile_vec(b3, Cout))], axis=1)
    P = slab.shape[1]

    x_flat = x.reshape(N * Cin, HW).astype(jnp.float32)

    kernel = functools.partial(
        _fused_kernel, H=H, W=W, nb=nb, cin=Cin, chid=Chid, cout=Cout,
        c_dw=c_dw, c_w3=c_w3, c_vec=c_vec, use_shortcut=use_shortcut)

    out_flat = pl.pallas_call(
        kernel,
        out_shape=jax.ShapeDtypeStruct((N * Cout, HW), jnp.float32),
        grid=(N // nb,),
        in_specs=[
            pl.BlockSpec((R, P), lambda n: (0, 0)),        # packed parameter slab
            pl.BlockSpec((ki, HW), lambda n: (n, 0)),      # nb images of x
        ],
        out_specs=pl.BlockSpec((ko, HW), lambda n: (n, 0)),
        compiler_params=pltpu.CompilerParams(
            dimension_semantics=("parallel",)),
    )(slab, x_flat)

    return out_flat.reshape(N, Cout, H, W)


# ---------------------------------------------------------------------------
# pure-JAX reference (for self-check)
# ---------------------------------------------------------------------------
def _ref_group_norm(y, gamma, beta, num_groups):
    N, C, H, W = y.shape
    yr = y.reshape(N, num_groups, (C // num_groups) * H * W)
    m = yr.mean(axis=2, keepdims=True)
    v = yr.var(axis=2, keepdims=True)
    yn = ((yr - m) / jnp.sqrt(v + EPS)).reshape(N, C, H, W)
    return yn * gamma[None, :, None, None] + beta[None, :, None, None]


def _ref_forward(x, params, *, stride=1):
    w1, g1, b1, wdw, g2, b2, w3, g3, b3 = params
    Chid = w1.shape[0]
    gelu = lambda t: 0.5 * t * (1.0 + jax.scipy.special.erf(t / jnp.sqrt(2.0)))
    h = jnp.einsum('oc,nchw->nohw', w1, x, precision=PREC_HI)
    h = gelu(_ref_group_norm(h, g1, b1, GROUPS))
    h = lax.conv_general_dilated(
        h, wdw.reshape(Chid, 1, 3, 3), (1, 1), ((1, 1), (1, 1)),
        dimension_numbers=('NCHW', 'OIHW', 'NCHW'),
        feature_group_count=Chid, precision=PREC_HI)
    h = gelu(_ref_group_norm(h, g2, b2, GROUPS))
    h = jnp.einsum('oc,nchw->nohw', w3, h, precision=PREC_HI)
    h = _ref_group_norm(h, g3, b3, GROUPS)
    if stride == 1 and x.shape[1] == w3.shape[0]:
        return x + h
    return h


if __name__ == "__main__":
    key = jax.random.PRNGKey(0)
    N, Cin, H, W = 2, 4, 16, 16
    expand = 2
    Cout = Cin                              # stride=1, in==out -> shortcut path
    Chid = Cin * expand
    ks = jax.random.split(key, 10)
    x = jax.random.normal(ks[0], (N, Cin, H, W), jnp.float32)
    params = (
        0.3 * jax.random.normal(ks[1], (Chid, Cin), jnp.float32),    # 1x1 expand conv weight
        1.0 + 0.1 * jax.random.normal(ks[2], (Chid,), jnp.float32),  # GN1 weight
        0.1 * jax.random.normal(ks[3], (Chid,), jnp.float32),        # GN1 bias
        0.3 * jax.random.normal(ks[4], (Chid, 3, 3), jnp.float32),   # depthwise 3x3 weight
        1.0 + 0.1 * jax.random.normal(ks[5], (Chid,), jnp.float32),  # GN2 weight
        0.1 * jax.random.normal(ks[6], (Chid,), jnp.float32),        # GN2 bias
        0.3 * jax.random.normal(ks[7], (Cout, Chid), jnp.float32),   # 1x1 project conv weight
        1.0 + 0.1 * jax.random.normal(ks[8], (Cout,), jnp.float32),  # GN3 weight
        0.1 * jax.random.normal(ks[9], (Cout,), jnp.float32),        # GN3 bias
    )

    out = inverted_depthwise_conv2d(x, params)
    out = jax.block_until_ready(out)

    ref = _ref_forward(x, params)
    np.testing.assert_allclose(np.asarray(out), np.asarray(ref), rtol=1e-3, atol=1e-4)
    print("KERNEL_OK")
</pallas_src>

<mosaic_0001>
module attributes {stable_mosaic.version = 11 : i64} {
  func.func @_fused_kernel(%arg0: i32, %arg1: memref<16x39xf32, #tpu.memory_space<vmem>>, %arg2: memref<8x256xf32, #tpu.memory_space<vmem>>, %arg3: memref<8x256xf32, #tpu.memory_space<vmem>>) attributes {dimension_semantics = [#tpu.dimension_semantics<parallel>], iteration_bounds = array<i64: 1>, scalar_prefetch = 0 : i64, scratch_operands = 0 : i64, tpu.core_type = #tpu.core_type<tc>, window_params = [{pipeline_mode = #tpu.pipeline_mode<synchronous>, transform_indices = @transform_0, window_bounds = array<i64: 16, 39>}, {transform_indices = @transform_1, window_bounds = array<i64: 8, 256>}, {transform_indices = @transform_2, window_bounds = array<i64: 8, 256>}]} {
    %c0 = arith.constant 0 : index
    %c0_0 = arith.constant 0 : index
    %0 = vector.load %arg2[%c0, %c0_0] : memref<8x256xf32, #tpu.memory_space<vmem>>, vector<8x256xf32>
    %c0_1 = arith.constant 0 : index
    %c0_2 = arith.constant 0 : index
    %1 = vector.load %arg1[%c0_1, %c0_2] : memref<16x39xf32, #tpu.memory_space<vmem>>, vector<16x39xf32>
    %2 = vector.extract_strided_slice %1 {offsets = [0, 0], sizes = [16, 8], strides = [1, 1]} : vector<16x39xf32> to vector<16x8xf32>
    %3 = vector.extract_strided_slice %1 {offsets = [0, 8], sizes = [16, 9], strides = [1, 1]} : vector<16x39xf32> to vector<16x9xf32>
    %4 = vector.extract_strided_slice %1 {offsets = [0, 17], sizes = [8, 16], strides = [1, 1]} : vector<16x39xf32> to vector<8x16xf32>
    %5 = vector.extract_strided_slice %1 {offsets = [0, 33], sizes = [16, 1], strides = [1, 1]} : vector<16x39xf32> to vector<16x1xf32>
    %6 = vector.extract_strided_slice %1 {offsets = [0, 34], sizes = [16, 1], strides = [1, 1]} : vector<16x39xf32> to vector<16x1xf32>
    %7 = vector.extract_strided_slice %1 {offsets = [0, 35], sizes = [16, 1], strides = [1, 1]} : vector<16x39xf32> to vector<16x1xf32>
    %8 = vector.extract_strided_slice %1 {offsets = [0, 36], sizes = [16, 1], strides = [1, 1]} : vector<16x39xf32> to vector<16x1xf32>
    %9 = vector.extract_strided_slice %1 {offsets = [0, 37], sizes = [8, 1], strides = [1, 1]} : vector<16x39xf32> to vector<8x1xf32>
    %10 = vector.extract_strided_slice %1 {offsets = [0, 38], sizes = [8, 1], strides = [1, 1]} : vector<16x39xf32> to vector<8x1xf32>
    %11 = vector.extract_strided_slice %2 {offsets = [0, 0], sizes = [16, 1], strides = [1, 1]} : vector<16x8xf32> to vector<16x1xf32>
    %12 = vector.extract_strided_slice %0 {offsets = [0, 0], sizes = [1, 256], strides = [1, 1]} : vector<8x256xf32> to vector<1x256xf32>
    %13 = vector.broadcast %11 : vector<16x1xf32> to vector<16x256xf32>
    %14 = vector.broadcast %12 : vector<1x256xf32> to vector<16x256xf32>
    %15 = arith.mulf %13, %14 : vector<16x256xf32>
    %16 = vector.extract_strided_slice %2 {offsets = [0, 1], sizes = [16, 1], strides = [1, 1]} : vector<16x8xf32> to vector<16x1xf32>
    %17 = vector.extract_strided_slice %0 {offsets = [1, 0], sizes = [1, 256], strides = [1, 1]} : vector<8x256xf32> to vector<1x256xf32>
    %18 = vector.broadcast %16 : vector<16x1xf32> to vector<16x256xf32>
    %19 = vector.broadcast %17 : vector<1x256xf32> to vector<16x256xf32>
    %20 = arith.mulf %18, %19 : vector<16x256xf32>
    %21 = vector.extract_strided_slice %2 {offsets = [0, 2], sizes = [16, 1], strides = [1, 1]} : vector<16x8xf32> to vector<16x1xf32>
    %22 = vector.extract_strided_slice %0 {offsets = [2, 0], sizes = [1, 256], strides = [1, 1]} : vector<8x256xf32> to vector<1x256xf32>
    %23 = vector.broadcast %21 : vector<16x1xf32> to vector<16x256xf32>
    %24 = vector.broadcast %22 : vector<1x256xf32> to vector<16x256xf32>
    %25 = arith.mulf %23, %24 : vector<16x256xf32>
    %26 = vector.extract_strided_slice %2 {offsets = [0, 3], sizes = [16, 1], strides = [1, 1]} : vector<16x8xf32> to vector<16x1xf32>
    %27 = vector.extract_strided_slice %0 {offsets = [3, 0], sizes = [1, 256], strides = [1, 1]} : vector<8x256xf32> to vector<1x256xf32>
    %28 = vector.broadcast %26 : vector<16x1xf32> to vector<16x256xf32>
    %29 = vector.broadcast %27 : vector<1x256xf32> to vector<16x256xf32>
    %30 = arith.mulf %28, %29 : vector<16x256xf32>
    %31 = vector.extract_strided_slice %2 {offsets = [0, 4], sizes = [16, 1], strides = [1, 1]} : vector<16x8xf32> to vector<16x1xf32>
    %32 = vector.extract_strided_slice %0 {offsets = [4, 0], sizes = [1, 256], strides = [1, 1]} : vector<8x256xf32> to vector<1x256xf32>
    %33 = vector.broadcast %31 : vector<16x1xf32> to vector<16x256xf32>
    %34 = vector.broadcast %32 : vector<1x256xf32> to vector<16x256xf32>
    %35 = arith.mulf %33, %34 : vector<16x256xf32>
    %36 = vector.extract_strided_slice %2 {offsets = [0, 5], sizes = [16, 1], strides = [1, 1]} : vector<16x8xf32> to vector<16x1xf32>
    %37 = vector.extract_strided_slice %0 {offsets = [5, 0], sizes = [1, 256], strides = [1, 1]} : vector<8x256xf32> to vector<1x256xf32>
    %38 = vector.broadcast %36 : vector<16x1xf32> to vector<16x256xf32>
    %39 = vector.broadcast %37 : vector<1x256xf32> to vector<16x256xf32>
    %40 = arith.mulf %38, %39 : vector<16x256xf32>
    %41 = vector.extract_strided_slice %2 {offsets = [0, 6], sizes = [16, 1], strides = [1, 1]} : vector<16x8xf32> to vector<16x1xf32>
    %42 = vector.extract_strided_slice %0 {offsets = [6, 0], sizes = [1, 256], strides = [1, 1]} : vector<8x256xf32> to vector<1x256xf32>
    %43 = vector.broadcast %41 : vector<16x1xf32> to vector<16x256xf32>
    %44 = vector.broadcast %42 : vector<1x256xf32> to vector<16x256xf32>
    %45 = arith.mulf %43, %44 : vector<16x256xf32>
    %46 = vector.extract_strided_slice %2 {offsets = [0, 7], sizes = [16, 1], strides = [1, 1]} : vector<16x8xf32> to vector<16x1xf32>
    %47 = vector.extract_strided_slice %0 {offsets = [7, 0], sizes = [1, 256], strides = [1, 1]} : vector<8x256xf32> to vector<1x256xf32>
    %48 = vector.broadcast %46 : vector<16x1xf32> to vector<16x256xf32>
    %49 = vector.broadcast %47 : vector<1x256xf32> to vector<16x256xf32>
    %50 = arith.mulf %48, %49 : vector<16x256xf32>
    %51 = arith.addf %15, %20 : vector<16x256xf32>
    %52 = arith.addf %25, %30 : vector<16x256xf32>
    %53 = arith.addf %35, %40 : vector<16x256xf32>
    %54 = arith.addf %45, %50 : vector<16x256xf32>
    %55 = arith.addf %51, %52 : vector<16x256xf32>
    %56 = arith.addf %53, %54 : vector<16x256xf32>
    %57 = arith.addf %55, %56 : vector<16x256xf32>
    %cst = arith.constant dense<0.000000e+00> : vector<16xf32>
    %58 = vector.multi_reduction <add>, %57, %cst [1] : vector<16x256xf32> to vector<16xf32>
    %59 = vector.shape_cast %58 : vector<16xf32> to vector<16x1xf32>
    %60 = tpu.iota {dimensions = array<i32: 0>} : vector<16x1xi32>
    %c2_i32 = arith.constant 2 : i32
    %c0_i32 = arith.constant 0 : i32
    %61 = arith.cmpi eq, %c2_i32, %c0_i32 : i32
    %c1_i32 = arith.constant 1 : i32
    %62 = arith.select %61, %c1_i32, %c2_i32 : i32
    %63 = vector.broadcast %62 : i32 to vector<16x1xi32>
    %64 = arith.remsi %60, %63 : vector<16x1xi32>
    %c0_i32_3 = arith.constant 0 : i32
    %65 = vector.broadcast %c0_i32_3 : i32 to vector<16x1xi32>
    %66 = arith.cmpi ne, %64, %65 : vector<16x1xi32>
    %c0_i32_4 = arith.constant 0 : i32
    %67 = vector.broadcast %c0_i32_4 : i32 to vector<16x1xi32>
    %68 = arith.cmpi slt, %64, %67 : vector<16x1xi32>
    %c0_i32_5 = arith.constant 0 : i32
    %69 = arith.cmpi slt, %62, %c0_i32_5 : i32
    %70 = vector.broadcast %69 : i1 to vector<16x1xi1>
    %71 = vector.broadcast %70 : vector<16x1xi1> to vector<16x1xi1>
    %72 = arith.xori %68, %71 : vector<16x1xi1>
    %73 = arith.andi %72, %66 : vector<16x1xi1>
    %74 = vector.broadcast %62 : i32 to vector<16x1xi32>
    %75 = arith.addi %64, %74 : vector<16x1xi32>
    %76 = arith.select %73, %75, %64 : vector<16x1xi1>, vector<16x1xi32>
    %c15_i32 = arith.constant 15 : i32
    %77 = tpu.dynamic_rotate %59 by %c15_i32 dim 0 : vector<16x1xf32>, i32 -> vector<16x1xf32>
    %c1_i32_6 = arith.constant 1 : i32
    %78 = tpu.dynamic_rotate %59 by %c1_i32_6 dim 0 : vector<16x1xf32>, i32 -> vector<16x1xf32>
    %c1_i32_7 = arith.constant 1 : i32
    %79 = vector.broadcast %c1_i32_7 : i32 to vector<16x1xi32>
    %80 = arith.addi %76, %79 : vector<16x1xi32>
    %c2_i32_8 = arith.constant 2 : i32
    %81 = vector.broadcast %c2_i32_8 : i32 to vector<16x1xi32>
    %82 = arith.cmpi slt, %80, %81 : vector<16x1xi32>
    %83 = arith.select %82, %77, %78 : vector<16x1xi1>, vector<16x1xf32>
    %84 = arith.addf %59, %83 : vector<16x1xf32>
    %cst_9 = arith.constant 0.001953125 : f32
    %85 = vector.broadcast %cst_9 : f32 to vector<16x1xf32>
    %86 = arith.mulf %84, %85 : vector<16x1xf32>
    %87 = vector.broadcast %86 : vector<16x1xf32> to vector<16x256xf32>
    %88 = arith.subf %57, %87 : vector<16x256xf32>
    %89 = arith.mulf %88, %88 : vector<16x256xf32>
    %cst_10 = arith.constant dense<0.000000e+00> : vector<16xf32>
    %90 = vector.multi_reduction <add>, %89, %cst_10 [1] : vector<16x256xf32> to vector<16xf32>
    %91 = vector.shape_cast %90 : vector<16xf32> to vector<16x1xf32>
    %92 = tpu.iota {dimensions = array<i32: 0>} : vector<16x1xi32>
    %c2_i32_11 = arith.constant 2 : i32
    %c0_i32_12 = arith.constant 0 : i32
    %93 = arith.cmpi eq, %c2_i32_11, %c0_i32_12 : i32
    %c1_i32_13 = arith.constant 1 : i32
    %94 = arith.select %93, %c1_i32_13, %c2_i32_11 : i32
    %95 = vector.broadcast %94 : i32 to vector<16x1xi32>
    %96 = arith.remsi %92, %95 : vector<16x1xi32>
    %c0_i32_14 = arith.constant 0 : i32
    %97 = vector.broadcast %c0_i32_14 : i32 to vector<16x1xi32>
    %98 = arith.cmpi ne, %96, %97 : vector<16x1xi32>
    %c0_i32_15 = arith.constant 0 : i32
    %99 = vector.broadcast %c0_i32_15 : i32 to vector<16x1xi32>
    %100 = arith.cmpi slt, %96, %99 : vector<16x1xi32>
    %c0_i32_16 = arith.constant 0 : i32
    %101 = arith.cmpi slt, %94, %c0_i32_16 : i32
    %102 = vector.broadcast %101 : i1 to vector<16x1xi1>
    %103 = vector.broadcast %102 : vector<16x1xi1> to vector<16x1xi1>
    %104 = arith.xori %100, %103 : vector<16x1xi1>
    %105 = arith.andi %104, %98 : vector<16x1xi1>
    %106 = vector.broadcast %94 : i32 to vector<16x1xi32>
    %107 = arith.addi %96, %106 : vector<16x1xi32>
    %108 = arith.select %105, %107, %96 : vector<16x1xi1>, vector<16x1xi32>
    %c15_i32_17 = arith.constant 15 : i32
    %109 = tpu.dynamic_rotate %91 by %c15_i32_17 dim 0 : vector<16x1xf32>, i32 -> vector<16x1xf32>
    %c1_i32_18 = arith.constant 1 : i32
    %110 = tpu.dynamic_rotate %91 by %c1_i32_18 dim 0 : vector<16x1xf32>, i32 -> vector<16x1xf32>
    %c1_i32_19 = arith.constant 1 : i32
    %111 = vector.broadcast %c1_i32_19 : i32 to vector<16x1xi32>
    %112 = arith.addi %108, %111 : vector<16x1xi32>
    %c2_i32_20 = arith.constant 2 : i32
    %113 = vector.broadcast %c2_i32_20 : i32 to vector<16x1xi32>
    %114 = arith.cmpi slt, %112, %113 : vector<16x1xi32>
    %115 = arith.select %114, %109, %110 : vector<16x1xi1>, vector<16x1xf32>
    %116 = arith.addf %91, %115 : vector<16x1xf32>
    %cst_21 = arith.constant 0.001953125 : f32
    %117 = vector.broadcast %cst_21 : f32 to vector<16x1xf32>
    %118 = arith.mulf %116, %117 : vector<16x1xf32>
    %cst_22 = arith.constant 9.99999974E-6 : f32
    %119 = vector.broadcast %cst_22 : f32 to vector<16x1xf32>
    %120 = arith.addf %118, %119 : vector<16x1xf32>
    %121 = math.rsqrt %120 : vector<16x1xf32>
    %122 = arith.mulf %121, %5 : vector<16x1xf32>
    %123 = vector.broadcast %122 : vector<16x1xf32> to vector<16x256xf32>
    %124 = arith.mulf %88, %123 : vector<16x256xf32>
    %125 = vector.broadcast %6 : vector<16x1xf32> to vector<16x256xf32>
    %126 = arith.addf %124, %125 : vector<16x256xf32>
    %cst_23 = arith.constant 5.000000e-01 : f32
    %127 = vector.broadcast %cst_23 : f32 to vector<16x256xf32>
    %128 = arith.mulf %127, %126 : vector<16x256xf32>
    %cst_24 = arith.constant 0.707106769 : f32
    %129 = vector.broadcast %cst_24 : f32 to vector<16x256xf32>
    %130 = arith.mulf %126, %129 : vector<16x256xf32>
    %cst_25 = arith.constant 0.000000e+00 : f32
    %131 = vector.broadcast %cst_25 : f32 to vector<16x256xf32>
    %132 = arith.cmpf oge, %130, %131 : vector<16x256xf32>
    %cst_26 = arith.constant 1.000000e+00 : f32
    %cst_27 = arith.constant -1.000000e+00 : f32
    %133 = vector.broadcast %cst_26 : f32 to vector<16x256xf32>
    %134 = vector.broadcast %cst_27 : f32 to vector<16x256xf32>
    %135 = arith.select %132, %133, %134 : vector<16x256xi1>, vector<16x256xf32>
    %136 = math.absf %130 : vector<16x256xf32>
    %cst_28 = arith.constant 0.327591091 : f32
    %137 = vector.broadcast %cst_28 : f32 to vector<16x256xf32>
    %138 = arith.mulf %137, %136 : vector<16x256xf32>
    %cst_29 = arith.constant 1.000000e+00 : f32
    %139 = vector.broadcast %cst_29 : f32 to vector<16x256xf32>
    %140 = arith.addf %139, %138 : vector<16x256xf32>
    %cst_30 = arith.constant 1.000000e+00 : f32
    %141 = vector.broadcast %cst_30 : f32 to vector<16x256xf32>
    %142 = arith.divf %141, %140 : vector<16x256xf32>
    %cst_31 = arith.constant 1.06140542 : f32
    %143 = vector.broadcast %cst_31 : f32 to vector<16x256xf32>
    %144 = arith.mulf %143, %142 : vector<16x256xf32>
    %cst_32 = arith.constant -1.45315206 : f32
    %145 = vector.broadcast %cst_32 : f32 to vector<16x256xf32>
    %146 = arith.addf %144, %145 : vector<16x256xf32>
    %147 = arith.mulf %146, %142 : vector<16x256xf32>
    %cst_33 = arith.constant 1.42141378 : f32
    %148 = vector.broadcast %cst_33 : f32 to vector<16x256xf32>
    %149 = arith.addf %147, %148 : vector<16x256xf32>
    %150 = arith.mulf %149, %142 : vector<16x256xf32>
    %cst_34 = arith.constant -0.284496725 : f32
    %151 = vector.broadcast %cst_34 : f32 to vector<16x256xf32>
    %152 = arith.addf %150, %151 : vector<16x256xf32>
    %153 = arith.mulf %152, %142 : vector<16x256xf32>
    %cst_35 = arith.constant 0.254829586 : f32
    %154 = vector.broadcast %cst_35 : f32 to vector<16x256xf32>
    %155 = arith.addf %153, %154 : vector<16x256xf32>
    %156 = arith.mulf %155, %142 : vector<16x256xf32>
    %cst_36 = arith.constant 0.000000e+00 : f32
    %157 = vector.broadcast %cst_36 : f32 to vector<16x256xf32>
    %158 = arith.subf %157, %136 : vector<16x256xf32>
    %159 = arith.mulf %158, %136 : vector<16x256xf32>
    %160 = math.exp %159 : vector<16x256xf32>
    %161 = arith.mulf %156, %160 : vector<16x256xf32>
    %cst_37 = arith.constant 1.000000e+00 : f32
    %162 = vector.broadcast %cst_37 : f32 to vector<16x256xf32>
    %163 = arith.subf %162, %161 : vector<16x256xf32>
    %164 = arith.mulf %135, %163 : vector<16x256xf32>
    %cst_38 = arith.constant 1.000000e+00 : f32
    %165 = vector.broadcast %cst_38 : f32 to vector<16x256xf32>
    %166 = arith.addf %165, %164 : vector<16x256xf32>
    %167 = arith.mulf %128, %166 : vector<16x256xf32>
    %168 = tpu.iota {dimensions = array<i32: 1>} : vector<1x256xi32>
    %c16_i32 = arith.constant 16 : i32
    %c0_i32_39 = arith.constant 0 : i32
    %169 = arith.cmpi eq, %c16_i32, %c0_i32_39 : i32
    %c1_i32_40 = arith.constant 1 : i32
    %170 = arith.select %169, %c1_i32_40, %c16_i32 : i32
    %171 = vector.broadcast %170 : i32 to vector<1x256xi32>
    %172 = arith.remsi %168, %171 : vector<1x256xi32>
    %c0_i32_41 = arith.constant 0 : i32
    %173 = vector.broadcast %c0_i32_41 : i32 to vector<1x256xi32>
    %174 = arith.cmpi ne, %172, %173 : vector<1x256xi32>
    %c0_i32_42 = arith.constant 0 : i32
    %175 = vector.broadcast %c0_i32_42 : i32 to vector<1x256xi32>
    %176 = arith.cmpi slt, %172, %175 : vector<1x256xi32>
    %c0_i32_43 = arith.constant 0 : i32
    %177 = arith.cmpi slt, %170, %c0_i32_43 : i32
    %178 = vector.broadcast %177 : i1 to vector<1x256xi1>
    %179 = vector.broadcast %178 : vector<1x256xi1> to vector<1x256xi1>
    %180 = arith.xori %176, %179 : vector<1x256xi1>
    %181 = arith.andi %180, %174 : vector<1x256xi1>
    %182 = vector.broadcast %170 : i32 to vector<1x256xi32>
    %183 = arith.addi %172, %182 : vector<1x256xi32>
    %184 = arith.select %181, %183, %172 : vector<1x256xi1>, vector<1x256xi32>
    %c14_i32 = arith.constant 14 : i32
    %185 = vector.broadcast %c14_i32 : i32 to vector<1x256xi32>
    %186 = arith.cmpi sle, %184, %185 : vector<1x256xi32>
    %187 = arith.extui %186 : vector<1x256xi1> to vector<1x256xi32>
    %188 = arith.sitofp %187 : vector<1x256xi32> to vector<1x256xf32>
    %189 = vector.broadcast %188 : vector<1x256xf32> to vector<16x256xf32>
    %190 = arith.mulf %167, %189 : vector<16x256xf32>
    %c1_i32_44 = arith.constant 1 : i32
    %191 = vector.broadcast %c1_i32_44 : i32 to vector<1x256xi32>
    %192 = arith.cmpi sge, %184, %191 : vector<1x256xi32>
    %193 = arith.extui %192 : vector<1x256xi1> to vector<1x256xi32>
    %194 = arith.sitofp %193 : vector<1x256xi32> to vector<1x256xf32>
    %195 = vector.broadcast %194 : vector<1x256xf32> to vector<16x256xf32>
    %196 = arith.mulf %167, %195 : vector<16x256xf32>
    %c17_i32 = arith.constant 17 : i32
    %197 = tpu.dynamic_rotate %190 by %c17_i32 dim 1 : vector<16x256xf32>, i32 -> vector<16x256xf32>
    %198 = vector.extract_strided_slice %3 {offsets = [0, 0], sizes = [16, 1], strides = [1, 1]} : vector<16x9xf32> to vector<16x1xf32>
    %199 = vector.broadcast %198 : vector<16x1xf32> to vector<16x256xf32>
    %200 = arith.mulf %199, %197 : vector<16x256xf32>
    %c16_i32_45 = arith.constant 16 : i32
    %201 = tpu.dynamic_rotate %167 by %c16_i32_45 dim 1 : vector<16x256xf32>, i32 -> vector<16x256xf32>
    %202 = vector.extract_strided_slice %3 {offsets = [0, 1], sizes = [16, 1], strides = [1, 1]} : vector<16x9xf32> to vector<16x1xf32>
    %203 = vector.broadcast %202 : vector<16x1xf32> to vector<16x256xf32>
    %204 = arith.mulf %203, %201 : vector<16x256xf32>
    %205 = arith.addf %200, %204 : vector<16x256xf32>
    %c15_i32_46 = arith.constant 15 : i32
    %206 = tpu.dynamic_rotate %196 by %c15_i32_46 dim 1 : vector<16x256xf32>, i32 -> vector<16x256xf32>
    %207 = vector.extract_strided_slice %3 {offsets = [0, 2], sizes = [16, 1], strides = [1, 1]} : vector<16x9xf32> to vector<16x1xf32>
    %208 = vector.broadcast %207 : vector<16x1xf32> to vector<16x256xf32>
    %209 = arith.mulf %208, %206 : vector<16x256xf32>
    %210 = arith.addf %205, %209 : vector<16x256xf32>
    %c16_i32_47 = arith.constant 16 : i32
    %211 = vector.broadcast %c16_i32_47 : i32 to vector<1x256xi32>
    %212 = arith.cmpi sge, %168, %211 : vector<1x256xi32>
    %213 = arith.extui %212 : vector<1x256xi1> to vector<1x256xi32>
    %214 = arith.sitofp %213 : vector<1x256xi32> to vector<1x256xf32>
    %215 = vector.broadcast %214 : vector<1x256xf32> to vector<16x256xf32>
    %216 = arith.mulf %210, %215 : vector<16x256xf32>
    %c1_i32_48 = arith.constant 1 : i32
    %217 = tpu.dynamic_rotate %190 by %c1_i32_48 dim 1 : vector<16x256xf32>, i32 -> vector<16x256xf32>
    %218 = vector.extract_strided_slice %3 {offsets = [0, 3], sizes = [16, 1], strides = [1, 1]} : vector<16x9xf32> to vector<16x1xf32>
    %219 = vector.broadcast %218 : vector<16x1xf32> to vector<16x256xf32>
    %220 = arith.mulf %219, %217 : vector<16x256xf32>
    %221 = vector.extract_strided_slice %3 {offsets = [0, 4], sizes = [16, 1], strides = [1, 1]} : vector<16x9xf32> to vector<16x1xf32>
    %222 = vector.broadcast %221 : vector<16x1xf32> to vector<16x256xf32>
    %223 = arith.mulf %222, %167 : vector<16x256xf32>
    %224 = arith.addf %220, %223 : vector<16x256xf32>
    %c255_i32 = arith.constant 255 : i32
    %225 = tpu.dynamic_rotate %196 by %c255_i32 dim 1 : vector<16x256xf32>, i32 -> vector<16x256xf32>
    %226 = vector.extract_strided_slice %3 {offsets = [0, 5], sizes = [16, 1], strides = [1, 1]} : vector<16x9xf32> to vector<16x1xf32>
    %227 = vector.broadcast %226 : vector<16x1xf32> to vector<16x256xf32>
    %228 = arith.mulf %227, %225 : vector<16x256xf32>
    %229 = arith.addf %224, %228 : vector<16x256xf32>
    %c241_i32 = arith.constant 241 : i32
    %230 = tpu.dynamic_rotate %190 by %c241_i32 dim 1 : vector<16x256xf32>, i32 -> vector<16x256xf32>
    %231 = vector.extract_strided_slice %3 {offsets = [0, 6], sizes = [16, 1], strides = [1, 1]} : vector<16x9xf32> to vector<16x1xf32>
    %232 = vector.broadcast %231 : vector<16x1xf32> to vector<16x256xf32>
    %233 = arith.mulf %232, %230 : vector<16x256xf32>
    %c240_i32 = arith.constant 240 : i32
    %234 = tpu.dynamic_rotate %167 by %c240_i32 dim 1 : vector<16x256xf32>, i32 -> vector<16x256xf32>
    %235 = vector.extract_strided_slice %3 {offsets = [0, 7], sizes = [16, 1], strides = [1, 1]} : vector<16x9xf32> to vector<16x1xf32>
    %236 = vector.broadcast %235 : vector<16x1xf32> to vector<16x256xf32>
    %237 = arith.mulf %236, %234 : vector<16x256xf32>
    %238 = arith.addf %233, %237 : vector<16x256xf32>
    %c239_i32 = arith.constant 239 : i32
    %239 = tpu.dynamic_rotate %196 by %c239_i32 dim 1 : vector<16x256xf32>, i32 -> vector<16x256xf32>
    %240 = vector.extract_strided_slice %3 {offsets = [0, 8], sizes = [16, 1], strides = [1, 1]} : vector<16x9xf32> to vector<16x1xf32>
    %241 = vector.broadcast %240 : vector<16x1xf32> to vector<16x256xf32>
    %242 = arith.mulf %241, %239 : vector<16x256xf32>
    %243 = arith.addf %238, %242 : vector<16x256xf32>
    %c240_i32_49 = arith.constant 240 : i32
    %244 = vector.broadcast %c240_i32_49 : i32 to vector<1x256xi32>
    %245 = arith.cmpi slt, %168, %244 : vector<1x256xi32>
    %246 = arith.extui %245 : vector<1x256xi1> to vector<1x256xi32>
    %247 = arith.sitofp %246 : vector<1x256xi32> to vector<1x256xf32>
    %248 = vector.broadcast %247 : vector<1x256xf32> to vector<16x256xf32>
    %249 = arith.mulf %243, %248 : vector<16x256xf32>
    %250 = arith.addf %216, %229 : vector<16x256xf32>
    %251 = arith.addf %250, %249 : vector<16x256xf32>
    %cst_50 = arith.constant dense<0.000000e+00> : vector<16xf32>
    %252 = vector.multi_reduction <add>, %251, %cst_50 [1] : vector<16x256xf32> to vector<16xf32>
    %253 = vector.shape_cast %252 : vector<16xf32> to vector<16x1xf32>
    %254 = tpu.iota {dimensions = array<i32: 0>} : vector<16x1xi32>
    %c2_i32_51 = arith.constant 2 : i32
    %c0_i32_52 = arith.constant 0 : i32
    %255 = arith.cmpi eq, %c2_i32_51, %c0_i32_52 : i32
    %c1_i32_53 = arith.constant 1 : i32
    %256 = arith.select %255, %c1_i32_53, %c2_i32_51 : i32
    %257 = vector.broadcast %256 : i32 to vector<16x1xi32>
    %258 = arith.remsi %254, %257 : vector<16x1xi32>
    %c0_i32_54 = arith.constant 0 : i32
    %259 = vector.broadcast %c0_i32_54 : i32 to vector<16x1xi32>
    %260 = arith.cmpi ne, %258, %259 : vector<16x1xi32>
    %c0_i32_55 = arith.constant 0 : i32
    %261 = vector.broadcast %c0_i32_55 : i32 to vector<16x1xi32>
    %262 = arith.cmpi slt, %258, %261 : vector<16x1xi32>
    %c0_i32_56 = arith.constant 0 : i32
    %263 = arith.cmpi slt, %256, %c0_i32_56 : i32
    %264 = vector.broadcast %263 : i1 to vector<16x1xi1>
    %265 = vector.broadcast %264 : vector<16x1xi1> to vector<16x1xi1>
    %266 = arith.xori %262, %265 : vector<16x1xi1>
    %267 = arith.andi %266, %260 : vector<16x1xi1>
    %268 = vector.broadcast %256 : i32 to vector<16x1xi32>
    %269 = arith.addi %258, %268 : vector<16x1xi32>
    %270 = arith.select %267, %269, %258 : vector<16x1xi1>, vector<16x1xi32>
    %c15_i32_57 = arith.constant 15 : i32
    %271 = tpu.dynamic_rotate %253 by %c15_i32_57 dim 0 : vector<16x1xf32>, i32 -> vector<16x1xf32>
    %c1_i32_58 = arith.constant 1 : i32
    %272 = tpu.dynamic_rotate %253 by %c1_i32_58 dim 0 : vector<16x1xf32>, i32 -> vector<16x1xf32>
    %c1_i32_59 = arith.constant 1 : i32
    %273 = vector.broadcast %c1_i32_59 : i32 to vector<16x1xi32>
    %274 = arith.addi %270, %273 : vector<16x1xi32>
    %c2_i32_60 = arith.constant 2 : i32
    %275 = vector.broadcast %c2_i32_60 : i32 to vector<16x1xi32>
    %276 = arith.cmpi slt, %274, %275 : vector<16x1xi32>
    %277 = arith.select %276, %271, %272 : vector<16x1xi1>, vector<16x1xf32>
    %278 = arith.addf %253, %277 : vector<16x1xf32>
    %cst_61 = arith.constant 0.001953125 : f32
    %279 = vector.broadcast %cst_61 : f32 to vector<16x1xf32>
    %280 = arith.mulf %278, %279 : vector<16x1xf32>
    %281 = vector.broadcast %280 : vector<16x1xf32> to vector<16x256xf32>
    %282 = arith.subf %251, %281 : vector<16x256xf32>
    %283 = arith.mulf %282, %282 : vector<16x256xf32>
    %cst_62 = arith.constant dense<0.000000e+00> : vector<16xf32>
    %284 = vector.multi_reduction <add>, %283, %cst_62 [1] : vector<16x256xf32> to vector<16xf32>
    %285 = vector.shape_cast %284 : vector<16xf32> to vector<16x1xf32>
    %286 = tpu.iota {dimensions = array<i32: 0>} : vector<16x1xi32>
    %c2_i32_63 = arith.constant 2 : i32
    %c0_i32_64 = arith.constant 0 : i32
    %287 = arith.cmpi eq, %c2_i32_63, %c0_i32_64 : i32
    %c1_i32_65 = arith.constant 1 : i32
    %288 = arith.select %287, %c1_i32_65, %c2_i32_63 : i32
    %289 = vector.broadcast %288 : i32 to vector<16x1xi32>
    %290 = arith.remsi %286, %289 : vector<16x1xi32>
    %c0_i32_66 = arith.constant 0 : i32
    %291 = vector.broadcast %c0_i32_66 : i32 to vector<16x1xi32>
    %292 = arith.cmpi ne, %290, %291 : vector<16x1xi32>
    %c0_i32_67 = arith.constant 0 : i32
    %293 = vector.broadcast %c0_i32_67 : i32 to vector<16x1xi32>
    %294 = arith.cmpi slt, %290, %293 : vector<16x1xi32>
    %c0_i32_68 = arith.constant 0 : i32
    %295 = arith.cmpi slt, %288, %c0_i32_68 : i32
    %296 = vector.broadcast %295 : i1 to vector<16x1xi1>
    %297 = vector.broadcast %296 : vector<16x1xi1> to vector<16x1xi1>
    %298 = arith.xori %294, %297 : vector<16x1xi1>
    %299 = arith.andi %298, %292 : vector<16x1xi1>
    %300 = vector.broadcast %288 : i32 to vector<16x1xi32>
    %301 = arith.addi %290, %300 : vector<16x1xi32>
    %302 = arith.select %299, %301, %290 : vector<16x1xi1>, vector<16x1xi32>
    %c15_i32_69 = arith.constant 15 : i32
    %303 = tpu.dynamic_rotate %285 by %c15_i32_69 dim 0 : vector<16x1xf32>, i32 -> vector<16x1xf32>
    %c1_i32_70 = arith.constant 1 : i32
    %304 = tpu.dynamic_rotate %285 by %c1_i32_70 dim 0 : vector<16x1xf32>, i32 -> vector<16x1xf32>
    %c1_i32_71 = arith.constant 1 : i32
    %305 = vector.broadcast %c1_i32_71 : i32 to vector<16x1xi32>
    %306 = arith.addi %302, %305 : vector<16x1xi32>
    %c2_i32_72 = arith.constant 2 : i32
    %307 = vector.broadcast %c2_i32_72 : i32 to vector<16x1xi32>
    %308 = arith.cmpi slt, %306, %307 : vector<16x1xi32>
    %309 = arith.select %308, %303, %304 : vector<16x1xi1>, vector<16x1xf32>
    %310 = arith.addf %285, %309 : vector<16x1xf32>
    %cst_73 = arith.constant 0.001953125 : f32
    %311 = vector.broadcast %cst_73 : f32 to vector<16x1xf32>
    %312 = arith.mulf %310, %311 : vector<16x1xf32>
    %cst_74 = arith.constant 9.99999974E-6 : f32
    %313 = vector.broadcast %cst_74 : f32 to vector<16x1xf32>
    %314 = arith.addf %312, %313 : vector<16x1xf32>
    %315 = math.rsqrt %314 : vector<16x1xf32>
    %316 = arith.mulf %315, %7 : vector<16x1xf32>
    %317 = vector.broadcast %316 : vector<16x1xf32> to vector<16x256xf32>
    %318 = arith.mulf %282, %317 : vector<16x256xf32>
    %319 = vector.broadcast %8 : vector<16x1xf32> to vector<16x256xf32>
    %320 = arith.addf %318, %319 : vector<16x256xf32>
    %cst_75 = arith.constant 5.000000e-01 : f32
    %321 = vector.broadcast %cst_75 : f32 to vector<16x256xf32>
    %322 = arith.mulf %321, %320 : vector<16x256xf32>
    %cst_76 = arith.constant 0.707106769 : f32
    %323 = vector.broadcast %cst_76 : f32 to vector<16x256xf32>
    %324 = arith.mulf %320, %323 : vector<16x256xf32>
    %cst_77 = arith.constant 0.000000e+00 : f32
    %325 = vector.broadcast %cst_77 : f32 to vector<16x256xf32>
    %326 = arith.cmpf oge, %324, %325 : vector<16x256xf32>
    %cst_78 = arith.constant 1.000000e+00 : f32
    %cst_79 = arith.constant -1.000000e+00 : f32
    %327 = vector.broadcast %cst_78 : f32 to vector<16x256xf32>
    %328 = vector.broadcast %cst_79 : f32 to vector<16x256xf32>
    %329 = arith.select %326, %327, %328 : vector<16x256xi1>, vector<16x256xf32>
    %330 = math.absf %324 : vector<16x256xf32>
    %cst_80 = arith.constant 0.327591091 : f32
    %331 = vector.broadcast %cst_80 : f32 to vector<16x256xf32>
    %332 = arith.mulf %331, %330 : vector<16x256xf32>
    %cst_81 = arith.constant 1.000000e+00 : f32
    %333 = vector.broadcast %cst_81 : f32 to vector<16x256xf32>
    %334 = arith.addf %333, %332 : vector<16x256xf32>
    %cst_82 = arith.constant 1.000000e+00 : f32
    %335 = vector.broadcast %cst_82 : f32 to vector<16x256xf32>
    %336 = arith.divf %335, %334 : vector<16x256xf32>
    %cst_83 = arith.constant 1.06140542 : f32
    %337 = vector.broadcast %cst_83 : f32 to vector<16x256xf32>
    %338 = arith.mulf %337, %336 : vector<16x256xf32>
    %cst_84 = arith.constant -1.45315206 : f32
    %339 = vector.broadcast %cst_84 : f32 to vector<16x256xf32>
    %340 = arith.addf %338, %339 : vector<16x256xf32>
    %341 = arith.mulf %340, %336 : vector<16x256xf32>
    %cst_85 = arith.constant 1.42141378 : f32
    %342 = vector.broadcast %cst_85 : f32 to vector<16x256xf32>
    %343 = arith.addf %341, %342 : vector<16x256xf32>
    %344 = arith.mulf %343, %336 : vector<16x256xf32>
    %cst_86 = arith.constant -0.284496725 : f32
    %345 = vector.broadcast %cst_86 : f32 to vector<16x256xf32>
    %346 = arith.addf %344, %345 : vector<16x256xf32>
    %347 = arith.mulf %346, %336 : vector<16x256xf32>
    %cst_87 = arith.constant 0.254829586 : f32
    %348 = vector.broadcast %cst_87 : f32 to vector<16x256xf32>
    %349 = arith.addf %347, %348 : vector<16x256xf32>
    %350 = arith.mulf %349, %336 : vector<16x256xf32>
    %cst_88 = arith.constant 0.000000e+00 : f32
    %351 = vector.broadcast %cst_88 : f32 to vector<16x256xf32>
    %352 = arith.subf %351, %330 : vector<16x256xf32>
    %353 = arith.mulf %352, %330 : vector<16x256xf32>
    %354 = math.exp %353 : vector<16x256xf32>
    %355 = arith.mulf %350, %354 : vector<16x256xf32>
    %cst_89 = arith.constant 1.000000e+00 : f32
    %356 = vector.broadcast %cst_89 : f32 to vector<16x256xf32>
    %357 = arith.subf %356, %355 : vector<16x256xf32>
    %358 = arith.mulf %329, %357 : vector<16x256xf32>
    %cst_90 = arith.constant 1.000000e+00 : f32
    %359 = vector.broadcast %cst_90 : f32 to vector<16x256xf32>
    %360 = arith.addf %359, %358 : vector<16x256xf32>
    %361 = arith.mulf %322, %360 : vector<16x256xf32>
    %362 = vector.extract_strided_slice %4 {offsets = [0, 0], sizes = [8, 1], strides = [1, 1]} : vector<8x16xf32> to vector<8x1xf32>
    %363 = vector.extract_strided_slice %361 {offsets = [0, 0], sizes = [1, 256], strides = [1, 1]} : vector<16x256xf32> to vector<1x256xf32>
    %364 = vector.broadcast %362 : vector<8x1xf32> to vector<8x256xf32>
    %365 = vector.broadcast %363 : vector<1x256xf32> to vector<8x256xf32>
    %366 = arith.mulf %364, %365 : vector<8x256xf32>
    %367 = vector.extract_strided_slice %4 {offsets = [0, 1], sizes = [8, 1], strides = [1, 1]} : vector<8x16xf32> to vector<8x1xf32>
    %368 = vector.extract_strided_slice %361 {offsets = [1, 0], sizes = [1, 256], strides = [1, 1]} : vector<16x256xf32> to vector<1x256xf32>
    %369 = vector.broadcast %367 : vector<8x1xf32> to vector<8x256xf32>
    %370 = vector.broadcast %368 : vector<1x256xf32> to vector<8x256xf32>
    %371 = arith.mulf %369, %370 : vector<8x256xf32>
    %372 = vector.extract_strided_slice %4 {offsets = [0, 2], sizes = [8, 1], strides = [1, 1]} : vector<8x16xf32> to vector<8x1xf32>
    %373 = vector.extract_strided_slice %361 {offsets = [2, 0], sizes = [1, 256], strides = [1, 1]} : vector<16x256xf32> to vector<1x256xf32>
    %374 = vector.broadcast %372 : vector<8x1xf32> to vector<8x256xf32>
    %375 = vector.broadcast %373 : vector<1x256xf32> to vector<8x256xf32>
    %376 = arith.mulf %374, %375 : vector<8x256xf32>
    %377 = vector.extract_strided_slice %4 {offsets = [0, 3], sizes = [8, 1], strides = [1, 1]} : vector<8x16xf32> to vector<8x1xf32>
    %378 = vector.extract_strided_slice %361 {offsets = [3, 0], sizes = [1, 256], strides = [1, 1]} : vector<16x256xf32> to vector<1x256xf32>
    %379 = vector.broadcast %377 : vector<8x1xf32> to vector<8x256xf32>
    %380 = vector.broadcast %378 : vector<1x256xf32> to vector<8x256xf32>
    %381 = arith.mulf %379, %380 : vector<8x256xf32>
    %382 = vector.extract_strided_slice %4 {offsets = [0, 4], sizes = [8, 1], strides = [1, 1]} : vector<8x16xf32> to vector<8x1xf32>
    %383 = vector.extract_strided_slice %361 {offsets = [4, 0], sizes = [1, 256], strides = [1, 1]} : vector<16x256xf32> to vector<1x256xf32>
    %384 = vector.broadcast %382 : vector<8x1xf32> to vector<8x256xf32>
    %385 = vector.broadcast %383 : vector<1x256xf32> to vector<8x256xf32>
    %386 = arith.mulf %384, %385 : vector<8x256xf32>
    %387 = vector.extract_strided_slice %4 {offsets = [0, 5], sizes = [8, 1], strides = [1, 1]} : vector<8x16xf32> to vector<8x1xf32>
    %388 = vector.extract_strided_slice %361 {offsets = [5, 0], sizes = [1, 256], strides = [1, 1]} : vector<16x256xf32> to vector<1x256xf32>
    %389 = vector.broadcast %387 : vector<8x1xf32> to vector<8x256xf32>
    %390 = vector.broadcast %388 : vector<1x256xf32> to vector<8x256xf32>
    %391 = arith.mulf %389, %390 : vector<8x256xf32>
    %392 = vector.extract_strided_slice %4 {offsets = [0, 6], sizes = [8, 1], strides = [1, 1]} : vector<8x16xf32> to vector<8x1xf32>
    %393 = vector.extract_strided_slice %361 {offsets = [6, 0], sizes = [1, 256], strides = [1, 1]} : vector<16x256xf32> to vector<1x256xf32>
    %394 = vector.broadcast %392 : vector<8x1xf32> to vector<8x256xf32>
    %395 = vector.broadcast %393 : vector<1x256xf32> to vector<8x256xf32>
    %396 = arith.mulf %394, %395 : vector<8x256xf32>
    %397 = vector.extract_strided_slice %4 {offsets = [0, 7], sizes = [8, 1], strides = [1, 1]} : vector<8x16xf32> to vector<8x1xf32>
    %398 = vector.extract_strided_slice %361 {offsets = [7, 0], sizes = [1, 256], strides = [1, 1]} : vector<16x256xf32> to vector<1x256xf32>
    %399 = vector.broadcast %397 : vector<8x1xf32> to vector<8x256xf32>
    %400 = vector.broadcast %398 : vector<1x256xf32> to vector<8x256xf32>
    %401 = arith.mulf %399, %400 : vector<8x256xf32>
    %402 = vector.extract_strided_slice %4 {offsets = [0, 8], sizes = [8, 1], strides = [1, 1]} : vector<8x16xf32> to vector<8x1xf32>
    %403 = vector.extract_strided_slice %361 {offsets = [8, 0], sizes = [1, 256], strides = [1, 1]} : vector<16x256xf32> to vector<1x256xf32>
    %404 = vector.broadcast %402 : vector<8x1xf32> to vector<8x256xf32>
    %405 = vector.broadcast %403 : vector<1x256xf32> to vector<8x256xf32>
    %406 = arith.mulf %404, %405 : vector<8x256xf32>
    %407 = vector.extract_strided_slice %4 {offsets = [0, 9], sizes = [8, 1], strides = [1, 1]} : vector<8x16xf32> to vector<8x1xf32>
    %408 = vector.extract_strided_slice %361 {offsets = [9, 0], sizes = [1, 256], strides = [1, 1]} : vector<16x256xf32> to vector<1x256xf32>
    %409 = vector.broadcast %407 : vector<8x1xf32> to vector<8x256xf32>
    %410 = vector.broadcast %408 : vector<1x256xf32> to vector<8x256xf32>
    %411 = arith.mulf %409, %410 : vector<8x256xf32>
    %412 = vector.extract_strided_slice %4 {offsets = [0, 10], sizes = [8, 1], strides = [1, 1]} : vector<8x16xf32> to vector<8x1xf32>
    %413 = vector.extract_strided_slice %361 {offsets = [10, 0], sizes = [1, 256], strides = [1, 1]} : vector<16x256xf32> to vector<1x256xf32>
    %414 = vector.broadcast %412 : vector<8x1xf32> to vector<8x256xf32>
    %415 = vector.broadcast %413 : vector<1x256xf32> to vector<8x256xf32>
    %416 = arith.mulf %414, %415 : vector<8x256xf32>
    %417 = vector.extract_strided_slice %4 {offsets = [0, 11], sizes = [8, 1], strides = [1, 1]} : vector<8x16xf32> to vector<8x1xf32>
    %418 = vector.extract_strided_slice %361 {offsets = [11, 0], sizes = [1, 256], strides = [1, 1]} : vector<16x256xf32> to vector<1x256xf32>
    %419 = vector.broadcast %417 : vector<8x1xf32> to vector<8x256xf32>
    %420 = vector.broadcast %418 : vector<1x256xf32> to vector<8x256xf32>
    %421 = arith.mulf %419, %420 : vector<8x256xf32>
    %422 = vector.extract_strided_slice %4 {offsets = [0, 12], sizes = [8, 1], strides = [1, 1]} : vector<8x16xf32> to vector<8x1xf32>
    %423 = vector.extract_strided_slice %361 {offsets = [12, 0], sizes = [1, 256], strides = [1, 1]} : vector<16x256xf32> to vector<1x256xf32>
    %424 = vector.broadcast %422 : vector<8x1xf32> to vector<8x256xf32>
    %425 = vector.broadcast %423 : vector<1x256xf32> to vector<8x256xf32>
    %426 = arith.mulf %424, %425 : vector<8x256xf32>
    %427 = vector.extract_strided_slice %4 {offsets = [0, 13], sizes = [8, 1], strides = [1, 1]} : vector<8x16xf32> to vector<8x1xf32>
    %428 = vector.extract_strided_slice %361 {offsets = [13, 0], sizes = [1, 256], strides = [1, 1]} : vector<16x256xf32> to vector<1x256xf32>
    %429 = vector.broadcast %427 : vector<8x1xf32> to vector<8x256xf32>
    %430 = vector.broadcast %428 : vector<1x256xf32> to vector<8x256xf32>
    %431 = arith.mulf %429, %430 : vector<8x256xf32>
    %432 = vector.extract_strided_slice %4 {offsets = [0, 14], sizes = [8, 1], strides = [1, 1]} : vector<8x16xf32> to vector<8x1xf32>
    %433 = vector.extract_strided_slice %361 {offsets = [14, 0], sizes = [1, 256], strides = [1, 1]} : vector<16x256xf32> to vector<1x256xf32>
    %434 = vector.broadcast %432 : vector<8x1xf32> to vector<8x256xf32>
    %435 = vector.broadcast %433 : vector<1x256xf32> to vector<8x256xf32>
    %436 = arith.mulf %434, %435 : vector<8x256xf32>
    %437 = vector.extract_strided_slice %4 {offsets = [0, 15], sizes = [8, 1], strides = [1, 1]} : vector<8x16xf32> to vector<8x1xf32>
    %438 = vector.extract_strided_slice %361 {offsets = [15, 0], sizes = [1, 256], strides = [1, 1]} : vector<16x256xf32> to vector<1x256xf32>
    %439 = vector.broadcast %437 : vector<8x1xf32> to vector<8x256xf32>
    %440 = vector.broadcast %438 : vector<1x256xf32> to vector<8x256xf32>
    %441 = arith.mulf %439, %440 : vector<8x256xf32>
    %442 = arith.addf %366, %371 : vector<8x256xf32>
    %443 = arith.addf %376, %381 : vector<8x256xf32>
    %444 = arith.addf %386, %391 : vector<8x256xf32>
    %445 = arith.addf %396, %401 : vector<8x256xf32>
    %446 = arith.addf %406, %411 : vector<8x256xf32>
    %447 = arith.addf %416, %421 : vector<8x256xf32>
    %448 = arith.addf %426, %431 : vector<8x256xf32>
    %449 = arith.addf %436, %441 : vector<8x256xf32>
    %450 = arith.addf %442, %443 : vector<8x256xf32>
    %451 = arith.addf %444, %445 : vector<8x256xf32>
    %452 = arith.addf %446, %447 : vector<8x256xf32>
    %453 = arith.addf %448, %449 : vector<8x256xf32>
    %454 = arith.addf %450, %451 : vector<8x256xf32>
    %455 = arith.addf %452, %453 : vector<8x256xf32>
    %456 = arith.addf %454, %455 : vector<8x256xf32>
    %cst_91 = arith.constant dense<0.000000e+00> : vector<8xf32>
    %457 = vector.multi_reduction <add>, %456, %cst_91 [1] : vector<8x256xf32> to vector<8xf32>
    %458 = vector.shape_cast %457 : vector<8xf32> to vector<8x1xf32>
    %cst_92 = arith.constant 3.906250e-03 : f32
    %459 = vector.broadcast %cst_92 : f32 to vector<8x1xf32>
    %460 = arith.mulf %458, %459 : vector<8x1xf32>
    %461 = vector.broadcast %460 : vector<8x1xf32> to vector<8x256xf32>
    %462 = arith.subf %456, %461 : vector<8x256xf32>
    %463 = arith.mulf %462, %462 : vector<8x256xf32>
    %cst_93 = arith.constant dense<0.000000e+00> : vector<8xf32>
    %464 = vector.multi_reduction <add>, %463, %cst_93 [1] : vector<8x256xf32> to vector<8xf32>
    %465 = vector.shape_cast %464 : vector<8xf32> to vector<8x1xf32>
    %cst_94 = arith.constant 3.906250e-03 : f32
    %466 = vector.broadcast %cst_94 : f32 to vector<8x1xf32>
    %467 = arith.mulf %465, %466 : vector<8x1xf32>
    %cst_95 = arith.constant 9.99999974E-6 : f32
    %468 = vector.broadcast %cst_95 : f32 to vector<8x1xf32>
    %469 = arith.addf %467, %468 : vector<8x1xf32>
    %470 = math.rsqrt %469 : vector<8x1xf32>
    %471 = arith.mulf %470, %9 : vector<8x1xf32>
    %472 = vector.broadcast %471 : vector<8x1xf32> to vector<8x256xf32>
    %473 = arith.mulf %462, %472 : vector<8x256xf32>
    %474 = vector.broadcast %10 : vector<8x1xf32> to vector<8x256xf32>
    %475 = arith.addf %473, %474 : vector<8x256xf32>
    %476 = arith.addf %475, %0 : vector<8x256xf32>
    %c0_96 = arith.constant 0 : index
    %c0_97 = arith.constant 0 : index
    %477 = vector.load %arg3[%c0_96, %c0_97] : memref<8x256xf32, #tpu.memory_space<vmem>>, vector<8x256xf32>
    tpu.vector_store %arg3[%c0_96, %c0_97], %476 {strides = array<i32>} : memref<8x256xf32, #tpu.memory_space<vmem>>, vector<8x256xf32>,
    return
  }
  func.func @transform_0(%arg0: i32) -> (i32, i32) {
    %c0_i32 = arith.constant 0 : i32
    %c0_i32_0 = arith.constant 0 : i32
    %c0_i32_1 = arith.constant 0 : i32
    return %c0_i32, %c0_i32_0 : i32, i32
  }
  func.func @transform_1(%arg0: i32) -> (i32, i32) {
    %c0_i32 = arith.constant 0 : i32
    %c0_i32_0 = arith.constant 0 : i32
    return %arg0, %c0_i32 : i32, i32
  }
  func.func @transform_2(%arg0: i32) -> (i32, i32) {
    %c0_i32 = arith.constant 0 : i32
    %c0_i32_0 = arith.constant 0 : i32
    return %arg0, %c0_i32 : i32, i32
  }
}

</mosaic_0001>

<bundles_post_ra>
// kernel: tpu_custom_call.1
= control target key start
LH: loop header
LB: loop body
LE: loop exit
PB: predicated region body
PF: predicated region fallthrough
CT: control target
= control target key end

     0   :  { %7 = vsyncpa [#allocation3], 0  ;;  %s2203_s0 = inlined_call_operand.hbm [shape: f32[16,39], index: 0, kind: input, shape index: {}]   ;;  %s2204_s1 = inlined_call_operand.hbm [shape: f32[8,256], index: 1, kind: input, shape index: {}]   ;;  %s2205_s2 = inlined_call_operand.hbm [shape: f32[8,256], index: 2, kind: output, shape index: {}]  }
   0x1   :  { %8 = vsyncpa [#allocation6], 0 }
   0x2   :  { %9 = vsyncpa [#allocation4], 0  ;;  %s1514_s9 = smov [#allocation2]  }
   0x3   :  { %s15_s10 = sshll.u32 %s1514_s9, 4  ;;  %s16_s10 = int_to_ptr.vmem [resolvable:$true] %s15_s10 }
   0x4   :  { %s1456_s11 = scalar_lea.vmem %s16_s10, 256  ;;  %p1461_p1 = scmp.lt.s32.totalorder %s16_s10, %s16_s10 }
   0x5   :  { %p1457_p0 = scmp.ne.s32.totalorder %s16_s10, %s1456_s11  ;;  %p1462_p2 = scmp.lt.s32.totalorder %s1456_s11, %s1456_s11 }
   0x7   :  { %p1463_p3 = por %p1462_p2, %p1461_p1 }
   0x9   :  { %p1464_p4 = pnand %p1463_p3, %p1457_p0 }
   0xb   :  { %1467 = shalt.err (!%p1464_p4)
}
   0xc   :  { %s1515_s12 = smov 128   ;;  %s1516_s13 = smov 8  }
   0xd   :  { %21 = dma.hbm_to_vmem [thread:$0]  %s2203_s0, 256, %s16_s10, [#allocation3], %s1515_s12, %s1515_s12, %s1516_s13  }
   0xe   :  { %s1517_s16 = smov [#allocation5]  }
   0xf   :  { %s28_s17 = sshll.u32 %s1517_s16, 4  ;;  %s29_s17 = int_to_ptr.vmem [resolvable:$true] %s28_s17 }
  0x10   :  { %s1476_s18 = scalar_lea.vmem %s29_s17, 256  ;;  %p1481_p6 = scmp.lt.s32.totalorder %s29_s17, %s29_s17 }
  0x11   :  { %p1477_p5 = scmp.ne.s32.totalorder %s29_s17, %s1476_s18  ;;  %p1482_p7 = scmp.lt.s32.totalorder %s1476_s18, %s1476_s18 }
  0x13   :  { %p1483_p8 = por %p1482_p7, %p1481_p6 }
  0x15   :  { %p1484_p9 = pnand %p1483_p8, %p1477_p5 }
  0x17   :  { %1487 = shalt.err (!%p1484_p9)
}
  0x18   :  { %31 = dma.hbm_to_vmem [thread:$0]  %s2204_s1, 256, %s29_s17, [#allocation6]  }
  0x19   :  { %1508 = dma.done.wait [#allocation3], 256  }
  0x1a   :  { %1509 = vsyncadd [#allocation3], 4294967040 }
  0x1b   :  { %1510 = dma.done.wait [#allocation6], 256  }
  0x1c   :  { %1511 = vsyncadd [#allocation6], 4294967040  ;;  %v1518_v0 = vmov 1   ;;  %v2207_v1 = vmov 0   ;;  %v1590_v2 = vld [vmem:[#allocation2] sm:$0xff]  ;;  %v1594_v3 = vld [vmem:[#allocation2 + $0x8] sm:$0xff]  ;;  %v2206_v15 = vlaneseq }
  0x1d   :  { %1347 = vset.pattern.permute.xlu1 %v1518_v0  ;;  %1346 = vset.pattern.permute.xlu0 %v2207_v1  ;;  %v1520_v4 = vmov 2   ;;  %v1521_v5 = vmov 3   ;;  %v1522_v6 = vmov 4   ;;  %v1523_v7 = vmov 5   ;;  %v38_v23 = vld [vmem:[#allocation5] sm:$0xff]  ;;  %v39_v24 = vld [vmem:[#allocation5 + $0x8] sm:$0xff] }
  0x1e   :  { %65 = vperm.xlu1 %1347, %v1590_v2   ;;  %44 = vperm.xlu0 %1346, %v1590_v2   ;;  %v1524_v8 = vmov 6   ;;  %v1525_v9 = vmov 7   ;;  %v1613_v17 = vshrl.u32 %v2206_v15, 7  ;;  %s1526_s0 = smov 95   ;;  %s1538_s1 = smov 16  }
  0x1f   :  { %s1539_s21 = smov 112   ;;  %s1541_s22 = smov 17  }
  0x20   :  { %v1616_v20 = vsub.s32 1, %v1613_v17  ;;  %v1619_v21 = vsub.s32 0, %v1613_v17  ;;  %v1624_v25 = vsub.s32 2, %v1613_v17  ;;  %v1627_v26 = vsub.s32 3, %v1613_v17  ;;  %s1542_s23 = smov 15   ;;  %s1543_s24 = smov 1  }
  0x21   :  { %v1630_v27 = vsub.s32 4, %v1613_v17  ;;  %v1637_v33 = vsub.s32 5, %v1613_v17  ;;  %v1640_v35 = vsub.s32 6, %v1613_v17  ;;  %v1645_v38 = vsub.s32 7, %v1613_v17  ;;  %s1544_s25 = smov 113   ;;  %s1545_s26 = smov 127  }
  0x22   :  { %69 = vperm.xlu1 %1347, %v1594_v3   ;;  %49 = vperm.xlu0 %1346, %v1594_v3   ;;  %2225 = vst [vmem:[#allocation11_spill] sm:$0xff] %v1616_v20  ;;  %2226 = vst [vmem:[#allocation12_spill] sm:$0xff] %v1627_v26  ;;  %v75_v28 = vrot.slane %v38_v23, %v1616_v20  ;;  %v79_v29 = vrot.slane %v39_v24, %v1616_v20  ;;  %vm267_vm0 = vcmp.lt.s32.totalorder %v1613_v17, 7  ;;  %s1546_s27 = smov 111   ;;  %s1547_s28 = smov 93  }
  0x23   :  { %2227 = vst [vmem:[#allocation13_spill] sm:$0xff] %v1630_v27  ;;  %v55_v30 = vrot.slane %v38_v23, %v1619_v21  ;;  %v59_v31 = vrot.slane %v39_v24, %v1619_v21  ;;  %2228 = vst [vmem:[#allocation14_spill] sm:$0xff] %v1637_v33  ;;  %v95_v36 = vrot.slane %v38_v23, %v1624_v25  ;;  %vm272_vm1 = vcmp.lt.s32.totalorder %v1613_v17, 1  ;;  %s1567_s29 = smov [#allocation7]  }
  0x24   :  { %2229 = vst [vmem:[#allocation15_spill] sm:$0xff] %v1640_v35  ;;  %v99_v37 = vrot.slane %v39_v24, %v1624_v25  ;;  %2230 = vst [vmem:[#allocation16_spill] sm:$0xff] %v1645_v38  ;;  %v115_v39 = vrot.slane %v38_v23, %v1627_v26  ;;  %v119_v40 = vrot.slane %v39_v24, %v1627_v26  ;;  %s1276_s30 = sshll.u32 %s1567_s29, 4  ;;  %s1277_s30 = int_to_ptr.vmem [resolvable:$true] %s1276_s30 }
  0x25   :  { %v135_v41 = vrot.slane %v38_v23, %v1630_v27  ;;  %v139_v42 = vrot.slane %v39_v24, %v1630_v27  ;;  %v155_v47 = vrot.slane %v38_v23, %v1637_v33  ;;  %v159_v48 = vrot.slane %v39_v24, %v1637_v33  ;;  %s1488_s3 = scalar_lea.vmem %s1277_s30, 256  ;;  %p1493_p11 = scmp.lt.s32.totalorder %s1277_s30, %s1277_s30 }
  0x26   :  { %1349 = vset.pattern.permute.xlu1 %v1520_v4  ;;  %1348 = vset.pattern.permute.xlu0 %v1520_v4  ;;  %v175_v49 = vrot.slane %v38_v23, %v1640_v35  ;;  %v179_v50 = vrot.slane %v39_v24, %v1640_v35  ;;  %v195_v55 = vrot.slane %v38_v23, %v1645_v38  ;;  %p1489_p10 = scmp.ne.s32.totalorder %s1277_s30, %s1488_s3  ;;  %p1494_p12 = scmp.lt.s32.totalorder %s1488_s3, %s1488_s3 }
  0x27   :  { %89 = vperm.xlu1 %1349, %v1594_v3   ;;  %85 = vperm.xlu0 %1348, %v1590_v2   ;;  %v199_v56 = vrot.slane %v39_v24, %v1645_v38 }
  0x28   :  { %p1495_p13 = por %p1494_p12, %p1493_p11 }
  0x2a   :  { %p1496_p0 = pnand %p1495_p13, %p1489_p10 }
  0x2b   :  { %1350 = vset.pattern.permute.xlu1 %v1521_v5  ;;  %1351 = vset.pattern.permute.xlu0 %v1521_v5 }
  0x2c   :  { %105 = vperm.xlu1 %1350, %v1590_v2   ;;  %109 = vperm.xlu0 %1351, %v1594_v3  }
  0x30   :  { %1352 = vset.pattern.permute.xlu1 %v1522_v6  ;;  %1353 = vset.pattern.permute.xlu0 %v1523_v7 }
  0x31   :  { %125 = vperm.xlu1 %1352, %v1590_v2   ;;  %145 = vperm.xlu0 %1353, %v1590_v2  }
  0x35   :  { %129 = vperm.xlu1 %1352, %v1594_v3   ;;  %1356 = vset.pattern.permute.xlu0 %v1524_v8 }
  0x36   :  { %169 = vperm.xlu0 %1356, %v1594_v3  }
  0x39   :  { %1354 = vset.pattern.permute.xlu1 %v1523_v7 }
  0x3a   :  { %149 = vperm.xlu1 %1354, %v1594_v3   ;;  %1358 = vset.pattern.permute.xlu0 %v2207_v1 }
  0x3e   :  { %1355 = vset.pattern.permute.xlu1 %v1524_v8 }
  0x3f   :  { %165 = vperm.xlu1 %1355, %v1590_v2  }
  0x43   :  { %1357 = vset.pattern.permute.xlu1 %v1525_v9 }
  0x44   :  { %185 = vperm.xlu1 %1357, %v1590_v2  }
  0x48   :  { %189 = vperm.xlu1 %1357, %v1594_v3  }
  0x4c   :  { %1359 = vset.pattern.permute.xlu1 %v2207_v1 }
  0x99   :  { %v66_v10 = vpop.permute.xlu1 %65  ;;  %v45_v13 = vpop.permute.xlu0 %44 }
  0x9a   :  { %v80_v43 = vmul.f32 %v75_v28, %v66_v10  ;;  %v81_v44 = vmul.f32 %v79_v29, %v66_v10  ;;  %v60_v45 = vmul.f32 %v55_v30, %v45_v13  ;;  %v61_v46 = vmul.f32 %v59_v31, %v45_v13 }
  0x9c   :  { %v204_v61 = vadd.f32 %v80_v43, %v60_v45  ;;  %v205_v62 = vadd.f32 %v81_v44, %v61_v46 }
  0x9d   :  { %v70_v11 = vpop.permute.xlu1 %69  ;;  %v50_v16 = vpop.permute.xlu0 %49 }
  0x9e   :  { %v82_v8 = vmul.f32 %v75_v28, %v70_v11  ;;  %v83_v9 = vmul.f32 %v79_v29, %v70_v11  ;;  %v62_v10 = vmul.f32 %v55_v30, %v50_v16  ;;  %v63_v13 = vmul.f32 %v59_v31, %v50_v16 }
  0xa2   :  { %v90_v12 = vpop.permute.xlu1 %89  ;;  %v86_v19 = vpop.permute.xlu0 %85 }
  0xa3   :  { %v100_v51 = vmul.f32 %v95_v36, %v86_v19  ;;  %v101_v52 = vmul.f32 %v99_v37, %v86_v19  ;;  %v102_v63 = vmul.f32 %v95_v36, %v90_v12  ;;  %v103_v0 = vmul.f32 %v99_v37, %v90_v12 }
  0xa7   :  { %v106_v14 = vpop.permute.xlu1 %105  ;;  %v110_v32 = vpop.permute.xlu0 %109 }
  0xa8   :  { %v120_v57 = vmul.f32 %v115_v39, %v106_v14  ;;  %v121_v58 = vmul.f32 %v119_v40, %v106_v14  ;;  %v122_v59 = vmul.f32 %v115_v39, %v110_v32  ;;  %v123_v60 = vmul.f32 %v119_v40, %v110_v32 }
  0xaa   :  { %v208_v19 = vadd.f32 %v120_v57, %v100_v51  ;;  %v209_v23 = vadd.f32 %v121_v58, %v101_v52  ;;  %v210_v15 = vadd.f32 %v122_v59, %v102_v63  ;;  %v211_v24 = vadd.f32 %v123_v60, %v103_v0 }
  0xab   :  { %v207_v57 = vadd.f32 %v83_v9, %v63_v13  ;;  %v245_v0 = vand.u32 1, %v1613_v17 }
  0xac   :  { %v126_v18 = vpop.permute.xlu1 %125  ;;  %v146_v53 = vpop.permute.xlu0 %145  ;;  %v220_v31 = vadd.f32 %v208_v19, %v204_v61  ;;  %v221_v46 = vadd.f32 %v209_v23, %v205_v62 }
  0xad   :  { %v140_v4 = vmul.f32 %v135_v41, %v126_v18  ;;  %v141_v5 = vmul.f32 %v139_v42, %v126_v18  ;;  %v160_v6 = vmul.f32 %v155_v47, %v146_v53  ;;  %v161_v7 = vmul.f32 %v159_v48, %v146_v53 }
  0xaf   :  { %v212_v36 = vadd.f32 %v160_v6, %v140_v4  ;;  %v213_v12 = vadd.f32 %v161_v7, %v141_v5  ;;  %v1663_v5 = vadd.s32 1, %v245_v0 }
  0xb0   :  { %v1621_v22 = vpop.permute.xlu1 %129 }
  0xb1   :  { %v170_v14 = vpop.permute.xlu0 %169  ;;  %v142_v16 = vmul.f32 %v135_v41, %v1621_v22  ;;  %v143_v29 = vmul.f32 %v139_v42, %v1621_v22  ;;  %v223_v41 = vadd.f32 %v211_v24, %v207_v57  ;;  %vm277_vm3 = vcmp.lt.s32.totalorder %v1663_v5, 2 }
  0xb2   :  { %v182_v28 = vmul.f32 %v175_v49, %v170_v14  ;;  %v183_v11 = vmul.f32 %v179_v50, %v170_v14  ;;  %v1555_v5 = vmov 19  }
  0xb5   :  { %v150_v34 = vpop.permute.xlu1 %149 }
  0xb6   :  { %v162_v37 = vmul.f32 %v155_v47, %v150_v34  ;;  %v163_v18 = vmul.f32 %v159_v48, %v150_v34 }
  0xb8   :  { %v214_v58 = vadd.f32 %v162_v37, %v142_v16  ;;  %v215_v47 = vadd.f32 %v163_v18, %v143_v29 }
  0xba   :  { %v166_v54 = vpop.permute.xlu1 %165 }
  0xbb   :  { %v180_v39 = vmul.f32 %v175_v49, %v166_v54  ;;  %v181_v32 = vmul.f32 %v179_v50, %v166_v54 }
  0xbf   :  { %v186_v1 = vpop.permute.xlu1 %185 }
  0xc0   :  { %v200_v40 = vmul.f32 %v195_v55, %v186_v1  ;;  %v201_v43 = vmul.f32 %v199_v56, %v186_v1  ;;  %v206_v1 = vadd.f32 %v82_v8, %v62_v10 }
  0xc2   :  { %v216_v44 = vadd.f32 %v200_v40, %v180_v39  ;;  %v217_v45 = vadd.f32 %v201_v43, %v181_v32  ;;  %v222_v50 = vadd.f32 %v210_v15, %v206_v1  ;;  %v1530_v1 = vmov 12  }
  0xc3   :  { %v190_v30 = vpop.permute.xlu1 %189 }
  0xc4   :  { %v202_v51 = vmul.f32 %v195_v55, %v190_v30  ;;  %v203_v52 = vmul.f32 %v199_v56, %v190_v30  ;;  %v224_v53 = vadd.f32 %v216_v44, %v212_v36  ;;  %v225_v54 = vadd.f32 %v217_v45, %v213_v12 }
  0xc5   :  { %v240_v56 = vadd.s32 8, %v1613_v17 }
  0xc6   :  { %v218_v34 = vadd.f32 %v202_v51, %v182_v28  ;;  %v219_v48 = vadd.f32 %v203_v52, %v183_v11  ;;  %v228_v59 = vadd.f32 %v224_v53, %v220_v31  ;;  %v229_v49 = vadd.f32 %v225_v54, %v221_v46 }
  0xc7   :  { %v252_v62 = vand.u32 1, %v240_v56  ;;  %v1527_v51 = vmov 34   ;;  %v2231_v52 = vmov 0   ;;  %v1528_v53 = vmov 9  }
  0xc8   :  { %v232_v60 = vadd.f32 %v229_v49, %v228_v59  ;;  %v226_v63 = vadd.f32 %v218_v34, %v214_v58  ;;  %v227_v22 = vadd.f32 %v219_v48, %v215_v47  ;;  %v1529_v54 = vmov 10  }
  0xc9   :  { %v1661_v4 = vadd.s32 1, %v252_v62 }
  0xca   :  { %233 = vadd.xlane.f32.xlu0 %v232_v60  ;;  %v230_v42 = vadd.f32 %v226_v63, %v222_v50  ;;  %v231_v61 = vadd.f32 %v227_v22, %v223_v41 }
  0xcb   :  { %vm278_vm2 = vcmp.lt.s32.totalorder %v1661_v4, 2  ;;  %v1554_v4 = vmov 17  }
  0xcc   :  { %v235_v55 = vadd.f32 %v231_v61, %v230_v42 }
  0xce   :  { %236 = vadd.xlane.f32.xlu1 %v235_v55 }
 0x153   :  { %v234_v6 = vpop.xlane.xlu0 %233 }
 0x154   :  { %v265_v7 = vrot.slane %v234_v6, 1  ;;  %v270_v8 = vrot.slane %v234_v6, 7 }
 0x157   :  { %v237_v15 = vpop.xlane.xlu1 %236 }
 0x158   :  { %v266_v9 = vrot.slane %v237_v15, 1  ;;  %v271_v10 = vrot.slane %v237_v15, 7 }
 0x15a   :  { %v269_v13 = vsel %vm267_vm0, %v266_v9, %v265_v7  ;;  %v273_v19 = vsel %vm272_vm1, %v270_v8, %v271_v10  ;;  %v268_v23 = vsel %vm267_vm0, %v265_v7, %v266_v9  ;;  %v274_v24 = vsel %vm272_vm1, %v271_v10, %v270_v8 }
 0x15b   :  { %v280_v14 = vsel %vm278_vm2, %v269_v13, %v273_v19  ;;  %v279_v39 = vsel %vm277_vm3, %v268_v23, %v274_v24  ;;  %v1531_v13 = vmov 8   ;;  %v1532_v19 = vmov 14  }
 0x15c   :  { %v282_v32 = vadd.f32 %v280_v14, %v237_v15  ;;  %v281_v40 = vadd.f32 %v279_v39, %v234_v6  ;;  %v1533_v23 = vmov 11   ;;  %v1534_v24 = vmov 13  }
 0x15d   :  { %v1535_v14 = vmov 16   ;;  %v1536_v39 = vmov 15  }
 0x15e   :  { %v284_v43 = vmul.f32 0.001953125, %v282_v32  ;;  %v283_v36 = vmul.f32 0.001953125, %v281_v40 }
 0x160   :  { %292 = vperm.xlu1 %1359, %v284_v43   ;;  %287 = vperm.xlu0 %1358, %v283_v36  }
 0x164   :  { %1360 = vset.pattern.permute.xlu1 %v1527_v51  ;;  %1364 = vset.pattern.permute.xlu0 %v1528_v53 }
 0x1db   :  { %v293_v12 = vpop.permute.xlu1 %292  ;;  %v288_v37 = vpop.permute.xlu0 %287 }
 0x1dc   :  { %v1681_v18 = vsub.f32 %v230_v42, %v293_v12  ;;  %v1683_v44 = vsub.f32 %v231_v61, %v293_v12  ;;  %v1685_v45 = vsub.f32 %v228_v59, %v288_v37  ;;  %v1687_v28 = vsub.f32 %v229_v49, %v288_v37 }
 0x1de   :  { %v301_v11 = vmul.f32 %v1681_v18, %v1681_v18  ;;  %v302_v16 = vmul.f32 %v1683_v44, %v1683_v44  ;;  %v299_v29 = vmul.f32 %v1685_v45, %v1685_v45  ;;  %v300_v30 = vmul.f32 %v1687_v28, %v1687_v28 }
 0x1e0   :  { %v306_v31 = vadd.f32 %v302_v16, %v301_v11  ;;  %v303_v46 = vadd.f32 %v300_v30, %v299_v29 }
 0x1e2   :  { %307 = vadd.xlane.f32.xlu0 %v306_v31  ;;  %304 = vadd.xlane.f32.xlu1 %v303_v46 }
 0x1f3   :  { %327 = vrot.lane.b32.xlu1 %v1590_v2, %s1526_s0 }
 0x1f7   :  { %350 = vperm.xlu1 %1360, %v1590_v2  }
 0x1f8   :  { %329 = vrot.lane.b32.xlu0 %v1594_v3, %s1526_s0 }
 0x1fb   :  { %1361 = vset.pattern.permute.xlu1 %v2231_v52 }
 0x1fc   :  { %555 = vperm.xlu0 %1364, %v1590_v2  }
 0x200   :  { %1367 = vset.pattern.permute.xlu0 %v1529_v54 }
 0x201   :  { %588 = vperm.xlu0 %1367, %v1594_v3  }
 0x205   :  { %1369 = vset.pattern.permute.xlu0 %v1530_v1 }
 0x206   :  { %635 = vperm.xlu0 %1369, %v1590_v2  }
 0x20a   :  { %1372 = vset.pattern.permute.xlu0 %v1532_v19 }
 0x20b   :  { %697 = vperm.xlu0 %1372, %v1594_v3  }
 0x20f   :  { %1374 = vset.pattern.permute.xlu0 %v1534_v24 }
 0x210   :  { %664 = vperm.xlu0 %1374, %v1590_v2  }
 0x214   :  { %1377 = vset.pattern.permute.xlu0 %v1535_v14 }
 0x215   :  { %751 = vperm.xlu0 %1377, %v1594_v3  }
 0x219   :  { %1378 = vset.pattern.permute.xlu0 %v2231_v52 }
 0x26b   :  { %v305_v57 = vpop.xlane.xlu1 %304  ;;  %v308_v58 = vpop.xlane.xlu0 %307 }
 0x26c   :  { %v309_v47 = vrot.slane %v305_v57, 1  ;;  %v313_v34 = vrot.slane %v305_v57, 7  ;;  %v310_v48 = vrot.slane %v308_v58, 1  ;;  %v314_v59 = vrot.slane %v308_v58, 7 }
 0x26e   :  { %v311_v49 = vsel %vm267_vm0, %v309_v47, %v310_v48  ;;  %v312_v50 = vsel %vm267_vm0, %v310_v48, %v309_v47  ;;  %v315_v60 = vsel %vm272_vm1, %v313_v34, %v314_v59  ;;  %v316_v41 = vsel %vm272_vm1, %v314_v59, %v313_v34 }
 0x26f   :  { %v317_v63 = vsel %vm277_vm3, %v311_v49, %v316_v41  ;;  %v318_v22 = vsel %vm278_vm2, %v312_v50, %v315_v60  ;;  %v328_v6 = vpop.permute.xlu1 %327  ;;  %v330_v9 = vpop.permute.xlu0 %329 }
 0x270   :  { %v319_v42 = vadd.f32 %v317_v63, %v305_v57  ;;  %v320_v61 = vadd.f32 %v318_v22, %v308_v58 }
 0x272   :  { %v321_v55 = vmul.f32 0.001953125, %v319_v42  ;;  %v322_v56 = vmul.f32 0.001953125, %v320_v61 }
 0x273   :  { %v351_v32 = vpop.permute.xlu1 %350 }
 0x274   :  { %v323_v62 = vadd.f32 1e-05, %v321_v55  ;;  %v324_v0 = vadd.f32 1e-05, %v322_v56 }
 0x276   :  { %1402 = vrsqrt.f32 %v323_v62 }
 0x277   :  { %1404 = vrsqrt.f32 %v324_v0 }
 0x283   :  { %v1403_v15 = vpop.eup %1402 }
 0x284   :  { %v333_v7 = vmul.f32 %v1403_v15, %v328_v6  ;;  %v1405_v8 = vpop.eup %1404 }
 0x285   :  { %v334_v10 = vmul.f32 %v1405_v8, %v330_v9 }
 0x286   :  { %337 = vperm.xlu1 %1361, %v333_v7  }
 0x28a   :  { %342 = vperm.xlu1 %1361, %v334_v10  }
 0x28e   :  { %1362 = vset.pattern.permute.xlu1 %v1527_v51 }
 0x28f   :  { %354 = vperm.xlu1 %1362, %v1594_v3  }
 0x293   :  { %1363 = vset.pattern.permute.xlu1 %v1531_v13 }
 0x294   :  { %530 = vperm.xlu1 %1363, %v1590_v2  }
 0x298   :  { %534 = vperm.xlu1 %1363, %v1594_v3  }
 0x29c   :  { %1365 = vset.pattern.permute.xlu1 %v1528_v53 }
 0x29d   :  { %559 = vperm.xlu1 %1365, %v1594_v3  }
 0x2a1   :  { %1366 = vset.pattern.permute.xlu1 %v1529_v54 }
 0x2a2   :  { %584 = vperm.xlu1 %1366, %v1590_v2  }
 0x2a6   :  { %1368 = vset.pattern.permute.xlu1 %v1533_v23 }
 0x2a7   :  { %623 = vperm.xlu1 %1368, %v1590_v2  }
 0x2ab   :  { %627 = vperm.xlu1 %1368, %v1594_v3  }
 0x2af   :  { %1370 = vset.pattern.permute.xlu1 %v1530_v1 }
 0x2b0   :  { %639 = vperm.xlu1 %1370, %v1594_v3  }
 0x2b4   :  { %1371 = vset.pattern.permute.xlu1 %v1532_v19 }
 0x2b5   :  { %693 = vperm.xlu1 %1371, %v1590_v2  }
 0x2b9   :  { %1373 = vset.pattern.permute.xlu1 %v1536_v39 }
 0x2ba   :  { %718 = vperm.xlu1 %1373, %v1590_v2  }
 0x2be   :  { %722 = vperm.xlu1 %1373, %v1594_v3  }
 0x2c2   :  { %1375 = vset.pattern.permute.xlu1 %v1534_v24 }
 0x2c3   :  { %668 = vperm.xlu1 %1375, %v1594_v3  }
 0x2c7   :  { %1376 = vset.pattern.permute.xlu1 %v1535_v14 }
 0x2c8   :  { %747 = vperm.xlu1 %1376, %v1590_v2  }
 0x2cc   :  { %1379 = vset.pattern.permute.xlu1 %v2231_v52 }
 0x301   :  { %v338_v40 = vpop.permute.xlu1 %337 }
 0x302   :  { %v345_v43 = vmul.f32 %v338_v40, %v1685_v45  ;;  %v346_v36 = vmul.f32 %v338_v40, %v1687_v28 }
 0x304   :  { %v1736_v12 = vadd.f32 %v351_v32, %v345_v43  ;;  %v1738_v37 = vadd.f32 %v351_v32, %v346_v36 }
 0x305   :  { %v343_v11 = vpop.permute.xlu1 %342 }
 0x306   :  { %v1741_v16 = vmul.f32 0.70710677, %v1736_v12  ;;  %v1744_v3 = vmul.f32 0.70710677, %v1738_v37  ;;  %v347_v30 = vmul.f32 %v343_v11, %v1681_v18  ;;  %v348_v45 = vmul.f32 %v343_v11, %v1683_v44 }
 0x308   :  { %v377_v2 = vand.u32 2147483647, %v1741_v16  ;;  %v378_v29 = vand.u32 2147483647, %v1744_v3  ;;  %vm369_vm4 = vcmp.ge.f32.partialorder %v1741_v16, 0.0  ;;  %vm370_vm5 = vcmp.ge.f32.partialorder %v1744_v3, 0.0 }
 0x30a   :  { %v381_v28 = vmul.f32 0.3275911, %v377_v2  ;;  %v382_v31 = vmul.f32 0.3275911, %v378_v29  ;;  %v355_v46 = vpop.permute.xlu1 %354  ;;  %v433_v59 = vsub.f32 0.0, %v377_v2  ;;  %v434_v50 = vsub.f32 0.0, %v378_v29 }
 0x30b   :  { %v1750_v51 = vadd.f32 %v355_v46, %v347_v30  ;;  %v1752_v53 = vadd.f32 %v355_v46, %v348_v45 }
 0x30c   :  { %v385_v54 = vadd.f32 1.0, %v381_v28  ;;  %v386_v1 = vadd.f32 1.0, %v382_v31  ;;  %v437_v60 = vmul.f32 %v433_v59, %v377_v2  ;;  %v438_v63 = vmul.f32 %v434_v50, %v378_v29 }
 0x30d   :  { %v1755_v57 = vmul.f32 0.70710677, %v1750_v51  ;;  %v1758_v58 = vmul.f32 0.70710677, %v1752_v53 }
 0x30e   :  { %1406 = vrcp.f32 %v385_v54  ;;  %v441_v56 = vmul.f32 1.442695, %v437_v60  ;;  %v443_v6 = vmul.f32 1.442695, %v438_v63 }
 0x30f   :  { %1408 = vrcp.f32 %v386_v1  ;;  %v379_v18 = vand.u32 2147483647, %v1755_v57  ;;  %v380_v44 = vand.u32 2147483647, %v1758_v58  ;;  %v1762_v41 = vpop.permute.xlu1 %530  ;;  %vm371_vm6 = vcmp.ge.f32.partialorder %v1755_v57, 0.0 }
 0x310   :  { %vm372_vm7 = vcmp.ge.f32.partialorder %v1758_v58, 0.0 }
 0x311   :  { %v383_v47 = vmul.f32 0.3275911, %v379_v18  ;;  %v384_v34 = vmul.f32 0.3275911, %v380_v44  ;;  %v435_v42 = vsub.f32 0.0, %v379_v18  ;;  %v436_v62 = vsub.f32 0.0, %v380_v44 }
 0x313   :  { %v387_v48 = vadd.f32 1.0, %v383_v47  ;;  %v388_v49 = vadd.f32 1.0, %v384_v34  ;;  %v1764_v7 = vpop.permute.xlu1 %534  ;;  %v439_v9 = vmul.f32 %v435_v42, %v379_v18  ;;  %v440_v13 = vmul.f32 %v436_v62, %v380_v44  ;;  %v1768_v47 = vpop.permute.xlu0 %555 }
 0x315   :  { %1410 = vrcp.f32 %v387_v48  ;;  %v445_v40 = vmul.f32 1.442695, %v439_v9  ;;  %v447_v11 = vmul.f32 1.442695, %v440_v13 }
 0x316   :  { %1412 = vrcp.f32 %v388_v49 }
 0x317   :  { %1414 = vpow2.f32 %v441_v56  ;;  %v1774_v9 = vpop.permute.xlu0 %588 }
 0x318   :  { %1416 = vpow2.f32 %v443_v6  ;;  %v1766_v2 = vpop.permute.xlu1 %559 }
 0x319   :  { %1418 = vpow2.f32 %v445_v40 }
 0x31a   :  { %1420 = vpow2.f32 %v447_v11  ;;  %v361_v11 = vmul.f32 0.5, %v1736_v12 }
 0x31b   :  { %v1407_v22 = vpop.eup %1406 }
 0x31c   :  { %v1409_v61 = vpop.eup %1408  ;;  %v397_v55 = vmul.f32 1.0614054, %v1407_v22 }
 0x31d   :  { %v398_v0 = vmul.f32 1.0614054, %v1409_v61  ;;  %v1770_v59 = vpop.permute.xlu1 %584 }
 0x31e   :  { %v401_v15 = vadd.f32 -1.4531521, %v397_v55 }
 0x31f   :  { %v402_v8 = vadd.f32 -1.4531521, %v398_v0 }
 0x320   :  { %v405_v10 = vmul.f32 %v1407_v22, %v401_v15 }
 0x321   :  { %v406_v19 = vmul.f32 %v1409_v61, %v402_v8 }
 0x322   :  { %v1411_v23 = vpop.eup %1410  ;;  %v409_v24 = vadd.f32 1.4214138, %v405_v10 }
 0x323   :  { %v1413_v14 = vpop.eup %1412  ;;  %v410_v39 = vadd.f32 1.4214138, %v406_v19  ;;  %v399_v32 = vmul.f32 1.0614054, %v1411_v23  ;;  %v1776_v19 = vpop.permute.xlu1 %623 }
 0x324   :  { %v413_v43 = vmul.f32 %v1407_v22, %v409_v24  ;;  %v400_v36 = vmul.f32 1.0614054, %v1413_v14  ;;  %v1415_v42 = vpop.eup %1414 }
 0x325   :  { %v414_v29 = vmul.f32 %v1409_v61, %v410_v39  ;;  %v403_v30 = vadd.f32 -1.4531521, %v399_v32  ;;  %v1417_v62 = vpop.eup %1416 }
 0x326   :  { %v417_v45 = vadd.f32 -0.28449672, %v413_v43  ;;  %v404_v28 = vadd.f32 -1.4531521, %v400_v36  ;;  %v1419_v3 = vpop.eup %1418 }
 0x327   :  { %v418_v31 = vadd.f32 -0.28449672, %v414_v29  ;;  %v407_v46 = vmul.f32 %v1411_v23, %v403_v30 }
 0x328   :  { %v421_v54 = vmul.f32 %v1407_v22, %v417_v45  ;;  %v408_v1 = vmul.f32 %v1413_v14, %v404_v28  ;;  %v1421_v45 = vpop.eup %1420  ;;  %v362_v28 = vmul.f32 0.5, %v1738_v37  ;;  %v2232_v37 = vlaneseq }
 0x329   :  { %v422_v18 = vmul.f32 %v1409_v61, %v418_v31  ;;  %v411_v44 = vadd.f32 1.4214138, %v407_v46 }
 0x32a   :  { %v425_v34 = vadd.f32 0.2548296, %v421_v54  ;;  %v412_v48 = vadd.f32 1.4214138, %v408_v1  ;;  %v636_v54 = vpop.permute.xlu0 %635 }
 0x32b   :  { %v426_v49 = vadd.f32 0.2548296, %v422_v18  ;;  %v415_v50 = vmul.f32 %v1411_v23, %v411_v44  ;;  %v1784_v44 = vpop.permute.xlu1 %627 }
 0x32c   :  { %v429_v60 = vmul.f32 %v1407_v22, %v425_v34  ;;  %v416_v63 = vmul.f32 %v1413_v14, %v412_v48  ;;  %v2209_v22 = vmov -1.0  }
 0x32d   :  { %v430_v55 = vmul.f32 %v1409_v61, %v426_v49  ;;  %v419_v56 = vadd.f32 -0.28449672, %v415_v50  ;;  %v373_v24 = vsel %vm369_vm4, 1.0, %v2209_v22  ;;  %v374_v32 = vsel %vm370_vm5, 1.0, %v2209_v22 }
 0x32e   :  { %v449_v0 = vmul.f32 %v1415_v42, %v429_v60  ;;  %v420_v6 = vadd.f32 -0.28449672, %v416_v63  ;;  %v375_v12 = vsel %vm371_vm6, 1.0, %v2209_v22  ;;  %v1790_v49 = vand.u32 127, %v2232_v37 }
 0x32f   :  { %v450_v15 = vmul.f32 %v1417_v62, %v430_v55  ;;  %v423_v8 = vmul.f32 %v1411_v23, %v419_v56  ;;  %v376_v57 = vsel %vm372_vm7, 1.0, %v2209_v22  ;;  %v363_v63 = vmul.f32 0.5, %v1750_v51  ;;  %v640_v62 = vpop.permute.xlu1 %639 }
 0x330   :  { %v453_v10 = vsub.f32 1.0, %v449_v0  ;;  %v424_v13 = vmul.f32 %v1413_v14, %v420_v6  ;;  %v364_v55 = vmul.f32 0.5, %v1752_v53  ;;  %v476_v0 = vand.u32 15, %v1790_v49 }
 0x331   :  { %v454_v61 = vsub.f32 1.0, %v450_v15  ;;  %v427_v39 = vadd.f32 0.2548296, %v423_v8  ;;  %v1799_v6 = vadd.s32 128, %v1790_v49  ;;  %v2211_v53 = vmov 0.0  }
 0x332   :  { %v457_v16 = vmul.f32 %v453_v10, %v373_v24  ;;  %v428_v40 = vadd.f32 0.2548296, %v424_v13  ;;  %vm496_vm8 = vcmp.le.s32.totalorder %v476_v0, 14  ;;  %vm506_vm11 = vcmp.ge.s32.totalorder %v476_v0, 1 }
 0x333   :  { %v458_v43 = vmul.f32 %v454_v61, %v374_v32  ;;  %v431_v36 = vmul.f32 %v1411_v23, %v427_v39  ;;  %v483_v51 = vand.u32 15, %v1799_v6  ;;  %v1286_v24 = vsel %vm496_vm8, 1.0, %v2211_v53 }
 0x334   :  { %v461_v29 = vadd.f32 1.0, %v457_v16  ;;  %v432_v30 = vmul.f32 %v1413_v14, %v428_v40  ;;  %vm617_vm12 = vcmp.lt.s32.totalorder %v1790_v49, 1  ;;  %vm524_vm13 = vcmp.lt.s32.totalorder %v1790_v49, 17 }
 0x335   :  { %v462_v31 = vadd.f32 1.0, %v458_v43  ;;  %v451_v46 = vmul.f32 %v1419_v3, %v431_v36  ;;  %vm497_vm9 = vcmp.le.s32.totalorder %v483_v51, 14  ;;  %vm507_vm10 = vcmp.ge.s32.totalorder %v483_v51, 1 }
 0x336   :  { %v465_v1 = vmul.f32 %v461_v29, %v361_v11  ;;  %v452_v18 = vmul.f32 %v1421_v45, %v432_v30  ;;  %v1287_v39 = vsel %vm497_vm9, 1.0, %v2211_v53  ;;  %v1289_v16 = vsel %vm507_vm10, 1.0, %v2211_v53  ;;  %v1810_v45 = vpop.permute.xlu1 %693 }
 0x337   :  { %v466_v23 = vmul.f32 %v462_v31, %v362_v28  ;;  %v455_v34 = vsub.f32 1.0, %v451_v46  ;;  %v1288_v3 = vsel %vm506_vm11, 1.0, %v2211_v53  ;;  %v1812_v28 = vpop.permute.xlu0 %697  ;;  %vm549_vm14 = vcmp.lt.s32.totalorder %v1790_v49, 16 }
 0x338   :  { %v456_v48 = vsub.f32 1.0, %v452_v18  ;;  %v1787_v14 = vmul.f32 %v636_v54, %v465_v1  ;;  %541 = vrot.lane.b32.xlu0 %v465_v1, %s1538_s1  ;;  %v502_v61 = vmul.f32 %v1286_v24, %v465_v1  ;;  %v512_v11 = vmul.f32 %v1288_v3, %v465_v1 }
 0x339   :  { %v459_v50 = vmul.f32 %v455_v34, %v375_v12  ;;  %v1793_v60 = vmul.f32 %v636_v54, %v466_v23  ;;  %v503_v32 = vmul.f32 %v1287_v39, %v466_v23  ;;  %v513_v43 = vmul.f32 %v1289_v16, %v466_v23 }
 0x33a   :  { %v460_v58 = vmul.f32 %v456_v48, %v376_v57  ;;  %v1814_v31 = vpop.permute.xlu1 %718  ;;  %vm578_vm15 = vcmp.lt.s32.totalorder %v1790_v49, 15  ;;  %vm658_vm4 = vcmp.lt.s32.totalorder %v1790_v49, 127  ;;  %vm712_vm5 = vcmp.lt.s32.totalorder %v1790_v49, 112 }
 0x33b   :  { %v463_v42 = vadd.f32 1.0, %v459_v50  ;;  %v665_v46 = vpop.permute.xlu0 %664  ;;  %vm687_vm6 = vcmp.lt.s32.totalorder %v1790_v49, 113  ;;  %vm599_vm7 = vcmp.ge.s32.totalorder %v1790_v49, 16  ;;  %vm741_vm8 = vcmp.lt.s32.totalorder %v1790_v49, 111 }
 0x33c   :  { %v464_v56 = vadd.f32 1.0, %v460_v58  ;;  %545 = vrot.lane.b32.xlu0 %v466_v23, %s1538_s1  ;;  %vm763_vm9 = vcmp.lt.s32.totalorder %v1799_v6, 240 }
 0x33d   :  { %v467_v15 = vmul.f32 %v463_v42, %v363_v63 }
 0x33e   :  { %v468_v8 = vmul.f32 %v464_v56, %v364_v55  ;;  %v1816_v54 = vpop.permute.xlu1 %722 }
 0x33f   :  { %v1801_v10 = vmul.f32 %v640_v62, %v467_v15  ;;  %543 = vrot.lane.b32.xlu1 %v467_v15, %s1538_s1  ;;  %v504_v40 = vmul.f32 %v1286_v24, %v467_v15  ;;  %v514_v29 = vmul.f32 %v1288_v3, %v467_v15 }
 0x340   :  { %v1803_v13 = vmul.f32 %v640_v62, %v468_v8  ;;  %704 = vrot.lane.b32.xlu0 %v465_v1, %s1539_s21  ;;  %v505_v36 = vmul.f32 %v1287_v39, %v468_v8  ;;  %v515_v30 = vmul.f32 %v1289_v16, %v468_v8  ;;  %v1818_v1 = vpop.permute.xlu0 %751 }
 0x342   :  { %v1820_v18 = vpop.permute.xlu1 %668 }
 0x343   :  { %547 = vrot.lane.b32.xlu1 %v468_v8, %s1538_s1 }
 0x344   :  { %708 = vrot.lane.b32.xlu0 %v466_v23, %s1539_s21 }
 0x346   :  { %v1822_v34 = vpop.permute.xlu1 %747 }
 0x347   :  { %706 = vrot.lane.b32.xlu1 %v467_v15, %s1539_s21 }
 0x348   :  { %516 = vrot.lane.b32.xlu0 %v502_v61, %s1541_s22 }
 0x34b   :  { %710 = vrot.lane.b32.xlu1 %v468_v8, %s1539_s21 }
 0x34c   :  { %520 = vrot.lane.b32.xlu0 %v503_v32, %s1541_s22 }
 0x34f   :  { %518 = vrot.lane.b32.xlu1 %v504_v40, %s1541_s22 }
 0x350   :  { %574 = vrot.lane.b32.xlu0 %v513_v43, %s1542_s23 }
 0x353   :  { %522 = vrot.lane.b32.xlu1 %v505_v36, %s1541_s22 }
 0x354   :  { %609 = vrot.lane.b32.xlu0 %v502_v61, %s1543_s24 }
 0x357   :  { %570 = vrot.lane.b32.xlu1 %v512_v11, %s1542_s23 }
 0x358   :  { %613 = vrot.lane.b32.xlu0 %v503_v32, %s1543_s24 }
 0x35b   :  { %572 = vrot.lane.b32.xlu1 %v514_v29, %s1542_s23 }
 0x35c   :  { %679 = vrot.lane.b32.xlu0 %v502_v61, %s1544_s25 }
 0x35f   :  { %576 = vrot.lane.b32.xlu1 %v515_v30, %s1542_s23 }
 0x360   :  { %683 = vrot.lane.b32.xlu0 %v503_v32, %s1544_s25 }
 0x363   :  { %611 = vrot.lane.b32.xlu1 %v504_v40, %s1543_s24 }
 0x364   :  { %650 = vrot.lane.b32.xlu0 %v512_v11, %s1545_s26 }
 0x367   :  { %615 = vrot.lane.b32.xlu1 %v505_v36, %s1543_s24 }
 0x368   :  { %654 = vrot.lane.b32.xlu0 %v513_v43, %s1545_s26 }
 0x36b   :  { %681 = vrot.lane.b32.xlu1 %v504_v40, %s1544_s25 }
 0x36c   :  { %733 = vrot.lane.b32.xlu0 %v512_v11, %s1546_s27 }
 0x36f   :  { %685 = vrot.lane.b32.xlu1 %v505_v36, %s1544_s25 }
 0x370   :  { %737 = vrot.lane.b32.xlu0 %v513_v43, %s1546_s27 }
 0x373   :  { %652 = vrot.lane.b32.xlu1 %v514_v29, %s1545_s26 }
 0x377   :  { %656 = vrot.lane.b32.xlu1 %v515_v30, %s1545_s26 }
 0x37b   :  { %735 = vrot.lane.b32.xlu1 %v514_v29, %s1546_s27 }
 0x37f   :  { %739 = vrot.lane.b32.xlu1 %v515_v30, %s1546_s27 }
 0x3aa   :  { %v542_v23 = vpop.permute.xlu0 %541 }
 0x3ae   :  { %v546_v12 = vpop.permute.xlu0 %545 }
 0x3af   :  { %v552_v11 = vsel %vm549_vm14, %v546_v12, %v542_v23  ;;  %v550_v26 = vsel %vm549_vm14, %v542_v23, %v546_v12 }
 0x3b0   :  { %v562_v53 = vmul.f32 %v1768_v47, %v552_v11 }
 0x3b1   :  { %v1824_v48 = vpop.permute.xlu1 %543 }
 0x3b2   :  { %v705_v37 = vpop.permute.xlu0 %704 }
 0x3b5   :  { %v1826_v57 = vpop.permute.xlu1 %547 }
 0x3b6   :  { %v709_v50 = vpop.permute.xlu0 %708 }
 0x3b9   :  { %v1828_v58 = vpop.permute.xlu1 %706 }
 0x3ba   :  { %v517_v63 = vpop.permute.xlu0 %516 }
 0x3bd   :  { %v1830_v42 = vpop.permute.xlu1 %710 }
 0x3be   :  { %v521_v55 = vpop.permute.xlu0 %520 }
 0x3bf   :  { %v527_v36 = vsel %vm524_vm13, %v521_v55, %v517_v63  ;;  %v525_v27 = vsel %vm524_vm13, %v517_v63, %v521_v55 }
 0x3c1   :  { %v1832_v56 = vpop.permute.xlu1 %518 }
 0x3c2   :  { %v575_v62 = vpop.permute.xlu0 %574 }
 0x3c5   :  { %v1834_v0 = vpop.permute.xlu1 %522 }
 0x3c6   :  { %v610_v15 = vpop.permute.xlu0 %609 }
 0x3c9   :  { %v571_v8 = vpop.permute.xlu1 %570 }
 0x3ca   :  { %v614_v51 = vpop.permute.xlu0 %613  ;;  %v581_v29 = vsel %vm578_vm15, %v575_v62, %v571_v8 }
 0x3cb   :  { %v618_v16 = vsel %vm617_vm12, %v610_v15, %v614_v51  ;;  %v620_v40 = vsel %vm617_vm12, %v614_v51, %v610_v15  ;;  %v537_v15 = vmul.f32 %v1762_v41, %v527_v36 }
 0x3cc   :  { %v630_v30 = vmul.f32 %v1776_v19, %v620_v40  ;;  %v631_v22 = vmul.f32 %v1776_v19, %v618_v16  ;;  %v591_v40 = vmul.f32 %v1770_v59, %v581_v29 }
 0x3cd   :  { %v1836_v24 = vpop.permute.xlu1 %572  ;;  %v566_v33 = vadd.f32 %v562_v53, %v537_v15  ;;  %v715_v53 = vsel %vm712_vm5, %v709_v50, %v705_v37 }
 0x3ce   :  { %v680_v61 = vpop.permute.xlu0 %679  ;;  %v646_v36 = vadd.f32 %v1787_v14, %v630_v30  ;;  %v647_v11 = vadd.f32 %v1793_v60, %v631_v22 }
 0x3cf   :  { %v595_v30 = vadd.f32 %v591_v40, %v566_v33 }
 0x3d1   :  { %v1838_v39 = vpop.permute.xlu1 %576 }
 0x3d2   :  { %v684_v32 = vpop.permute.xlu0 %683 }
 0x3d3   :  { %v688_v63 = vsel %vm687_vm6, %v680_v61, %v684_v32  ;;  %v690_v55 = vsel %vm687_vm6, %v684_v32, %v680_v61  ;;  %v2233_v61 = vmov 0.0  }
 0x3d4   :  { %v1889_v32 = vsel %vm599_vm7, 1.0, %v2233_v61  ;;  %v700_v23 = vmul.f32 %v1810_v45, %v688_v63  ;;  %v701_v12 = vmul.f32 %v1810_v45, %v690_v55  ;;  %v1291_v40 = vsel %vm763_vm9, 1.0, %v2233_v61 }
 0x3d5   :  { %v1848_v43 = vpop.permute.xlu1 %611  ;;  %v528_v63 = vsel %vm524_vm13, %v1834_v0, %v1832_v56 }
 0x3d6   :  { %v651_v3 = vpop.permute.xlu0 %650 }
 0x3d9   :  { %v1860_v51 = vpop.permute.xlu1 %615 }
 0x3da   :  { %v655_v38 = vpop.permute.xlu0 %654 }
 0x3db   :  { %v659_v19 = vsel %vm658_vm4, %v651_v3, %v655_v38  ;;  %v661_v16 = vsel %vm658_vm4, %v655_v38, %v651_v3  ;;  %v713_v38 = vsel %vm712_vm5, %v705_v37, %v709_v50  ;;  %v579_v3 = vsel %vm578_vm15, %v571_v8, %v575_v62 }
 0x3dc   :  { %v671_v20 = vmul.f32 %v665_v46, %v659_v19  ;;  %v672_v35 = vmul.f32 %v665_v46, %v661_v16  ;;  %v538_v46 = vmul.f32 %v1762_v41, %v525_v27  ;;  %v725_v37 = vmul.f32 %v1814_v31, %v713_v38 }
 0x3dd   :  { %v682_v29 = vpop.permute.xlu1 %681  ;;  %v726_v27 = vmul.f32 %v1814_v31, %v715_v53  ;;  %v592_v41 = vmul.f32 %v1770_v59, %v579_v3  ;;  %v605_v62 = vmul.f32 %v1889_v32, %v595_v30  ;;  %v553_v59 = vsel %vm549_vm14, %v1826_v57, %v1824_v48 }
 0x3de   :  { %v675_v14 = vadd.f32 %v671_v20, %v646_v36  ;;  %v676_v22 = vadd.f32 %v672_v35, %v647_v11  ;;  %v734_v60 = vpop.permute.xlu0 %733  ;;  %v563_v20 = vmul.f32 %v1768_v47, %v550_v26  ;;  %v729_v26 = vadd.f32 %v725_v37, %v700_v23 }
 0x3df   :  { %v730_v47 = vadd.f32 %v726_v27, %v701_v12  ;;  %v564_v53 = vmul.f32 %v1766_v2, %v553_v59  ;;  %v619_v3 = vsel %vm617_vm12, %v1848_v43, %v1860_v51 }
 0x3e0   :  { %v567_v33 = vadd.f32 %v563_v20, %v538_v46  ;;  %v772_v11 = vadd.f32 %v675_v14, %v605_v62  ;;  %v526_v14 = vsel %vm524_vm13, %v1832_v56, %v1834_v0  ;;  %v714_v56 = vsel %vm712_vm5, %v1828_v58, %v1830_v42 }
 0x3e1   :  { %v686_v35 = vpop.permute.xlu1 %685  ;;  %v539_v0 = vmul.f32 %v1764_v7, %v528_v63  ;;  %v540_v23 = vmul.f32 %v1764_v7, %v526_v14  ;;  %v716_v20 = vsel %vm712_vm5, %v1830_v42, %v1828_v58  ;;  %v633_v7 = vmul.f32 %v1784_v44, %v619_v3 }
 0x3e2   :  { %v738_v50 = vpop.permute.xlu0 %737  ;;  %v596_v19 = vadd.f32 %v592_v41, %v567_v33  ;;  %v689_v30 = vsel %vm687_vm6, %v682_v29, %v686_v35  ;;  %v691_v61 = vsel %vm687_vm6, %v686_v35, %v682_v29  ;;  %v580_v41 = vsel %vm578_vm15, %v1836_v24, %v1838_v39 }
 0x3e3   :  { %v742_v45 = vsel %vm741_vm8, %v734_v60, %v738_v50  ;;  %v744_v8 = vsel %vm741_vm8, %v738_v50, %v734_v60  ;;  %v551_v60 = vsel %vm549_vm14, %v1824_v48, %v1826_v57  ;;  %v621_v48 = vsel %vm617_vm12, %v1860_v51, %v1848_v43 }
 0x3e4   :  { %v754_v15 = vmul.f32 %v1822_v34, %v742_v45  ;;  %v755_v31 = vmul.f32 %v1822_v34, %v744_v8  ;;  %v773_v38 = vadd.f32 %v676_v22, %v596_v19  ;;  %v582_v22 = vsel %vm578_vm15, %v1838_v39, %v1836_v24 }
 0x3e5   :  { %v653_v6 = vpop.permute.xlu1 %652  ;;  %v593_v37 = vmul.f32 %v1774_v9, %v582_v22  ;;  %v632_v29 = vmul.f32 %v1784_v44, %v621_v48  ;;  %v565_v27 = vmul.f32 %v1766_v2, %v551_v60  ;;  %v702_v50 = vmul.f32 %v1812_v28, %v689_v30 }
 0x3e6   :  { %v758_v16 = vadd.f32 %v754_v15, %v729_v26  ;;  %v759_v36 = vadd.f32 %v755_v31, %v730_v47  ;;  %v703_v33 = vmul.f32 %v1812_v28, %v691_v61  ;;  %v568_v58 = vadd.f32 %v564_v53, %v539_v0 }
 0x3e7   :  { %v727_v44 = vmul.f32 %v1816_v54, %v714_v56  ;;  %v728_v45 = vmul.f32 %v1816_v54, %v716_v20  ;;  %v569_v2 = vadd.f32 %v565_v27, %v540_v23  ;;  %v594_v8 = vmul.f32 %v1774_v9, %v580_v41 }
 0x3e8   :  { %v769_v55 = vmul.f32 %v1291_v40, %v759_v36  ;;  %v1915_v34 = vadd.f32 %v772_v11, %v758_v16  ;;  %v597_v26 = vadd.f32 %v593_v37, %v568_v58  ;;  %v648_v24 = vadd.f32 %v1801_v10, %v632_v29 }
 0x3e9   :  { %v657_v46 = vpop.permute.xlu1 %656  ;;  %v649_v39 = vadd.f32 %v1803_v13, %v633_v7  ;;  %v731_v28 = vadd.f32 %v727_v44, %v702_v50  ;;  %v732_v15 = vadd.f32 %v728_v45, %v703_v33  ;;  %v598_v19 = vadd.f32 %v594_v8, %v569_v2 }
 0x3ea   :  { %v1938_v57 = vadd.f32 %v773_v38, %v769_v55  ;;  %v660_v43 = vsel %vm658_vm4, %v653_v6, %v657_v46  ;;  %v662_v51 = vsel %vm658_vm4, %v657_v46, %v653_v6  ;;  %v607_v10 = vmul.f32 %v1889_v32, %v597_v26 }
 0x3eb   :  { %v673_v42 = vmul.f32 %v1820_v18, %v660_v43  ;;  %v674_v62 = vmul.f32 %v1820_v18, %v662_v51  ;;  %v1550_v44 = vmov 21   ;;  %v1551_v45 = vmov 24  }
 0x3ec   :  { %v780_v12 = vadd.f32 %v1938_v57, %v1915_v34  ;;  %v1552_v2 = vmov 27   ;;  %v1553_v8 = vmov 30  }
 0x3ed   :  { %v736_v35 = vpop.permute.xlu1 %735  ;;  %v677_v59 = vadd.f32 %v673_v42, %v648_v24  ;;  %v678_v6 = vadd.f32 %v674_v62, %v649_v39  ;;  %v1548_v42 = vmov 36   ;;  %v1549_v62 = vmov 18  }
 0x3ee   :  { %781 = vadd.xlane.f32.xlu0 %v780_v12 }
 0x3ef   :  { %v774_v11 = vadd.f32 %v677_v59, %v607_v10  ;;  %v775_v63 = vadd.f32 %v678_v6, %v598_v19 }
 0x3f1   :  { %v740_v47 = vpop.permute.xlu1 %739 }
 0x3f2   :  { %v743_v31 = vsel %vm741_vm8, %v736_v35, %v740_v47  ;;  %v745_v18 = vsel %vm741_vm8, %v740_v47, %v736_v35 }
 0x3f3   :  { %v756_v54 = vmul.f32 %v1818_v1, %v743_v31  ;;  %v757_v9 = vmul.f32 %v1818_v1, %v745_v18 }
 0x3f5   :  { %v760_v16 = vadd.f32 %v756_v54, %v731_v28  ;;  %v761_v13 = vadd.f32 %v757_v9, %v732_v15 }
 0x3f7   :  { %v771_v36 = vmul.f32 %v1291_v40, %v761_v13  ;;  %v778_v55 = vadd.f32 %v774_v11, %v760_v16 }
 0x3f9   :  { %v779_v38 = vadd.f32 %v775_v63, %v771_v36 }
 0x3fb   :  { %v783_v60 = vadd.f32 %v779_v38, %v778_v55 }
 0x3fd   :  { %784 = vadd.xlane.f32.xlu1 %v783_v60 }
 0x477   :  { %v782_v49 = vpop.xlane.xlu0 %781 }
 0x478   :  { %v786_v14 = vrot.slane %v782_v49, 1  ;;  %v790_v46 = vrot.slane %v782_v49, 7 }
 0x486   :  { %v785_v53 = vpop.xlane.xlu1 %784 }
 0x487   :  { %v787_v22 = vrot.slane %v785_v53, 1  ;;  %v791_v3 = vrot.slane %v785_v53, 7 }
 0x489   :  { %v789_v1 = vsel %vm267_vm0, %v787_v22, %v786_v14  ;;  %v792_v32 = vsel %vm272_vm1, %v790_v46, %v791_v3  ;;  %v788_v40 = vsel %vm267_vm0, %v786_v14, %v787_v22  ;;  %v793_v48 = vsel %vm272_vm1, %v791_v3, %v790_v46 }
 0x48a   :  { %v795_v56 = vsel %vm278_vm2, %v789_v1, %v792_v32  ;;  %v794_v0 = vsel %vm277_vm3, %v788_v40, %v793_v48  ;;  %v1558_v14 = vmov 23   ;;  %v1559_v46 = vmov 25  }
 0x48b   :  { %v797_v30 = vadd.f32 %v795_v56, %v785_v53  ;;  %v796_v61 = vadd.f32 %v794_v0, %v782_v49  ;;  %v1556_v49 = vmov 20   ;;  %v1557_v53 = vmov 22  }
 0x48c   :  { %v1560_v22 = vmov 26   ;;  %v1561_v3 = vmov 28   ;;  %v1562_v1 = vmov 29   ;;  %v1563_v32 = vmov 31  }
 0x48d   :  { %v799_v23 = vmul.f32 0.001953125, %v797_v30  ;;  %v798_v43 = vmul.f32 0.001953125, %v796_v61  ;;  %v1564_v40 = vmov 32  }
 0x48f   :  { %807 = vperm.xlu1 %1379, %v799_v23   ;;  %802 = vperm.xlu0 %1378, %v798_v43  }
 0x493   :  { %1380 = vset.pattern.permute.xlu1 %v1548_v42  ;;  %1384 = vset.pattern.permute.xlu0 %v1549_v62 }
 0x50a   :  { %v808_v51 = vpop.permute.xlu1 %807  ;;  %v803_v12 = vpop.permute.xlu0 %802 }
 0x50b   :  { %v1996_v20 = vsub.f32 %v778_v55, %v808_v51  ;;  %v1998_v37 = vsub.f32 %v779_v38, %v808_v51  ;;  %v2001_v29 = vsub.f32 %v1915_v34, %v803_v12  ;;  %v2004_v7 = vsub.f32 %v1938_v57, %v803_v12  ;;  %v2014_v34 = vld [vmem:[#allocation2] sm:$0xff]  ;;  %v1445_v57 = vld [vmem:[#allocation2 + $0x8] sm:$0xff] }
 0x50d   :  { %v814_v35 = vmul.f32 %v2001_v29, %v2001_v29  ;;  %v815_v27 = vmul.f32 %v2004_v7, %v2004_v7  ;;  %v816_v41 = vmul.f32 %v1996_v20, %v1996_v20  ;;  %v817_v50 = vmul.f32 %v1998_v37, %v1998_v37 }
 0x50f   :  { %v821_v33 = vadd.f32 %v817_v50, %v816_v41  ;;  %v818_v58 = vadd.f32 %v815_v27, %v814_v35 }
 0x511   :  { %822 = vadd.xlane.f32.xlu0 %v821_v33  ;;  %819 = vadd.xlane.f32.xlu1 %v818_v58 }
 0x522   :  { %842 = vrot.lane.b32.xlu1 %v2014_v34, %s1547_s28 }
 0x526   :  { %865 = vperm.xlu1 %1380, %v2014_v34  }
 0x527   :  { %844 = vrot.lane.b32.xlu0 %v1445_v57, %s1547_s28 }
 0x52a   :  { %1381 = vset.pattern.permute.xlu1 %v2231_v52 }
 0x52b   :  { %999 = vperm.xlu0 %1384, %v2014_v34  }
 0x52f   :  { %1387 = vset.pattern.permute.xlu0 %v1550_v44 }
 0x530   :  { %1041 = vperm.xlu0 %1387, %v2014_v34  }
 0x534   :  { %1390 = vset.pattern.permute.xlu0 %v1551_v45 }
 0x535   :  { %1083 = vperm.xlu0 %1390, %v2014_v34  }
 0x539   :  { %1393 = vset.pattern.permute.xlu0 %v1552_v2 }
 0x53a   :  { %1125 = vperm.xlu0 %1393, %v2014_v34  }
 0x53e   :  { %1396 = vset.pattern.permute.xlu0 %v1553_v8 }
 0x53f   :  { %1167 = vperm.xlu0 %1396, %v2014_v34  }
 0x59a   :  { %v820_v52 = vpop.xlane.xlu1 %819  ;;  %v823_v26 = vpop.xlane.xlu0 %822 }
 0x59b   :  { %v824_v24 = vrot.slane %v820_v52, 1  ;;  %v828_v39 = vrot.slane %v820_v52, 7  ;;  %v825_v47 = vrot.slane %v823_v26, 1  ;;  %v829_v28 = vrot.slane %v823_v26, 7 }
 0x59d   :  { %v826_v15 = vsel %vm267_vm0, %v824_v24, %v825_v47  ;;  %v827_v31 = vsel %vm267_vm0, %v825_v47, %v824_v24  ;;  %v830_v18 = vsel %vm272_vm1, %v828_v39, %v829_v28  ;;  %v831_v59 = vsel %vm272_vm1, %v829_v28, %v828_v39 }
 0x59e   :  { %v832_v6 = vsel %vm277_vm3, %v826_v15, %v831_v59  ;;  %v833_v54 = vsel %vm278_vm2, %v827_v31, %v830_v18  ;;  %v843_v11 = vpop.permute.xlu1 %842  ;;  %v845_v17 = vpop.permute.xlu0 %844 }
 0x59f   :  { %v834_v9 = vadd.f32 %v832_v6, %v820_v52  ;;  %v835_v19 = vadd.f32 %v833_v54, %v823_v26 }
 0x5a1   :  { %v836_v10 = vmul.f32 0.001953125, %v834_v9  ;;  %v837_v16 = vmul.f32 0.001953125, %v835_v19 }
 0x5a2   :  { %v866_v48 = vpop.permute.xlu1 %865 }
 0x5a3   :  { %v838_v13 = vadd.f32 1e-05, %v836_v10  ;;  %v839_v36 = vadd.f32 1e-05, %v837_v16 }
 0x5a5   :  { %1422 = vrsqrt.f32 %v838_v13 }
 0x5a6   :  { %1424 = vrsqrt.f32 %v839_v36 }
 0x5b2   :  { %v1423_v63 = vpop.eup %1422 }
 0x5b3   :  { %v848_v55 = vmul.f32 %v1423_v63, %v843_v11  ;;  %v1425_v38 = vpop.eup %1424 }
 0x5b4   :  { %v849_v60 = vmul.f32 %v1425_v38, %v845_v17 }
 0x5b5   :  { %852 = vperm.xlu1 %1381, %v848_v55  }
 0x5b9   :  { %857 = vperm.xlu1 %1381, %v849_v60  }
 0x5bd   :  { %1382 = vset.pattern.permute.xlu1 %v1548_v42 }
 0x5be   :  { %869 = vperm.xlu1 %1382, %v1445_v57  }
 0x5c2   :  { %1383 = vset.pattern.permute.xlu1 %v1554_v4 }
 0x5c3   :  { %985 = vperm.xlu1 %1383, %v2014_v34  }
 0x5c7   :  { %1385 = vset.pattern.permute.xlu1 %v1555_v5 }
 0x5c8   :  { %1013 = vperm.xlu1 %1385, %v2014_v34  }
 0x5cc   :  { %1386 = vset.pattern.permute.xlu1 %v1556_v49 }
 0x5cd   :  { %1027 = vperm.xlu1 %1386, %v2014_v34  }
 0x5d1   :  { %1388 = vset.pattern.permute.xlu1 %v1557_v53 }
 0x5d2   :  { %1055 = vperm.xlu1 %1388, %v2014_v34  }
 0x5d6   :  { %1389 = vset.pattern.permute.xlu1 %v1558_v14 }
 0x5d7   :  { %1069 = vperm.xlu1 %1389, %v2014_v34  }
 0x5db   :  { %1391 = vset.pattern.permute.xlu1 %v1559_v46 }
 0x5dc   :  { %1097 = vperm.xlu1 %1391, %v2014_v34  }
 0x5e0   :  { %1392 = vset.pattern.permute.xlu1 %v1560_v22 }
 0x5e1   :  { %1111 = vperm.xlu1 %1392, %v2014_v34  }
 0x5e5   :  { %1394 = vset.pattern.permute.xlu1 %v1561_v3 }
 0x5e6   :  { %1139 = vperm.xlu1 %1394, %v2014_v34  }
 0x5ea   :  { %1395 = vset.pattern.permute.xlu1 %v1562_v1 }
 0x5eb   :  { %1153 = vperm.xlu1 %1395, %v2014_v34  }
 0x5ef   :  { %1397 = vset.pattern.permute.xlu1 %v1563_v32 }
 0x5f0   :  { %1181 = vperm.xlu1 %1397, %v2014_v34  }
 0x5f4   :  { %1398 = vset.pattern.permute.xlu1 %v1564_v40 }
 0x5f5   :  { %1195 = vperm.xlu1 %1398, %v2014_v34  }
 0x630   :  { %v853_v56 = vpop.permute.xlu1 %852 }
 0x631   :  { %v860_v0 = vmul.f32 %v853_v56, %v2001_v29  ;;  %v861_v30 = vmul.f32 %v853_v56, %v2004_v7 }
 0x633   :  { %v2049_v61 = vadd.f32 %v866_v48, %v860_v0  ;;  %v2051_v23 = vadd.f32 %v866_v48, %v861_v30 }
 0x634   :  { %v858_v43 = vpop.permute.xlu1 %857 }
 0x635   :  { %v2054_v51 = vmul.f32 0.70710677, %v2049_v61  ;;  %v2057_v12 = vmul.f32 0.70710677, %v2051_v23  ;;  %v862_v41 = vmul.f32 %v858_v43, %v1996_v20  ;;  %v863_v29 = vmul.f32 %v858_v43, %v1998_v37 }
 0x637   :  { %v892_v35 = vand.u32 2147483647, %v2054_v51  ;;  %v893_v27 = vand.u32 2147483647, %v2057_v12  ;;  %vm884_vm0 = vcmp.ge.f32.partialorder %v2054_v51, 0.0  ;;  %vm885_vm1 = vcmp.ge.f32.partialorder %v2057_v12, 0.0 }
 0x639   :  { %v896_v7 = vmul.f32 0.3275911, %v892_v35  ;;  %v897_v50 = vmul.f32 0.3275911, %v893_v27  ;;  %v870_v33 = vpop.permute.xlu1 %869  ;;  %v948_v24 = vsub.f32 0.0, %v892_v35  ;;  %v949_v28 = vsub.f32 0.0, %v893_v27 }
 0x63a   :  { %v2063_v58 = vadd.f32 %v870_v33, %v862_v41  ;;  %v2065_v57 = vadd.f32 %v870_v33, %v863_v29 }
 0x63b   :  { %v900_v42 = vadd.f32 1.0, %v896_v7  ;;  %v901_v62 = vadd.f32 1.0, %v897_v50  ;;  %v952_v15 = vmul.f32 %v948_v24, %v892_v35  ;;  %v953_v31 = vmul.f32 %v949_v28, %v893_v27 }
 0x63c   :  { %v2068_v44 = vmul.f32 0.70710677, %v2063_v58  ;;  %v2071_v45 = vmul.f32 0.70710677, %v2065_v57 }
 0x63d   :  { %1426 = vrcp.f32 %v900_v42  ;;  %v956_v19 = vmul.f32 1.442695, %v952_v15  ;;  %v958_v13 = vmul.f32 1.442695, %v953_v31 }
 0x63e   :  { %1428 = vrcp.f32 %v901_v62  ;;  %v894_v20 = vand.u32 2147483647, %v2068_v44  ;;  %v2074_v37 = vpop.permute.xlu1 %985  ;;  %v895_v2 = vand.u32 2147483647, %v2071_v45  ;;  %vm886_vm2 = vcmp.ge.f32.partialorder %v2068_v44, 0.0 }
 0x63f   :  { %vm887_vm3 = vcmp.ge.f32.partialorder %v2071_v45, 0.0 }
 0x640   :  { %v898_v8 = vmul.f32 0.3275911, %v894_v20  ;;  %v899_v52 = vmul.f32 0.3275911, %v895_v2  ;;  %v950_v6 = vsub.f32 0.0, %v894_v20  ;;  %v951_v10 = vsub.f32 0.0, %v895_v2 }
 0x642   :  { %v902_v26 = vadd.f32 1.0, %v898_v8  ;;  %v903_v39 = vadd.f32 1.0, %v899_v52  ;;  %v954_v63 = vmul.f32 %v950_v6, %v894_v20  ;;  %v955_v17 = vmul.f32 %v951_v10, %v895_v2 }
 0x643   :  { %v2077_v47 = vpop.permute.xlu1 %1013  ;;  %v2234_v10 = vmov -1.0  }
 0x644   :  { %1430 = vrcp.f32 %v902_v26  ;;  %v960_v46 = vmul.f32 1.442695, %v954_v63  ;;  %v962_v1 = vmul.f32 1.442695, %v955_v17  ;;  %v876_v63 = vmul.f32 0.5, %v2049_v61 }
 0x645   :  { %1432 = vrcp.f32 %v903_v39 }
 0x646   :  { %1434 = vpow2.f32 %v956_v19  ;;  %v2089_v19 = vpop.permute.xlu0 %999 }
 0x647   :  { %1436 = vpow2.f32 %v958_v13 }
 0x648   :  { %v2079_v18 = vpop.permute.xlu1 %1027  ;;  %1438 = vpow2.f32 %v960_v46 }
 0x649   :  { %1440 = vpow2.f32 %v962_v1 }
 0x64a   :  { %v1427_v59 = vpop.eup %1426 }
 0x64b   :  { %v1429_v54 = vpop.eup %1428  ;;  %v912_v9 = vmul.f32 1.0614054, %v1427_v59 }
 0x64c   :  { %v913_v16 = vmul.f32 1.0614054, %v1429_v54 }
 0x64d   :  { %v916_v36 = vadd.f32 -1.4531521, %v912_v9  ;;  %v2081_v55 = vpop.permute.xlu1 %1055 }
 0x64e   :  { %v917_v11 = vadd.f32 -1.4531521, %v913_v16  ;;  %v888_v16 = vsel %vm884_vm0, 1.0, %v2234_v10 }
 0x64f   :  { %v920_v38 = vmul.f32 %v1427_v59, %v916_v36 }
 0x650   :  { %v921_v60 = vmul.f32 %v1429_v54, %v917_v11 }
 0x651   :  { %v1431_v4 = vpop.eup %1430  ;;  %v924_v5 = vadd.f32 1.4214138, %v920_v38 }
 0x652   :  { %v1433_v49 = vpop.eup %1432  ;;  %v925_v53 = vadd.f32 1.4214138, %v921_v60  ;;  %v914_v14 = vmul.f32 1.0614054, %v1431_v4  ;;  %v2083_v48 = vpop.permute.xlu1 %1069 }
 0x653   :  { %v928_v22 = vmul.f32 %v1427_v59, %v924_v5  ;;  %v915_v3 = vmul.f32 1.0614054, %v1433_v49  ;;  %v1435_v8 = vpop.eup %1434 }
 0x654   :  { %v929_v32 = vmul.f32 %v1429_v54, %v925_v53  ;;  %v918_v40 = vadd.f32 -1.4531521, %v914_v14  ;;  %v1437_v24 = vpop.eup %1436  ;;  %v877_v14 = vmul.f32 0.5, %v2051_v23 }
 0x655   :  { %v932_v56 = vadd.f32 -0.28449672, %v928_v22  ;;  %v919_v0 = vadd.f32 -1.4531521, %v915_v3  ;;  %v1439_v17 = vpop.eup %1438 }
 0x656   :  { %v933_v30 = vadd.f32 -0.28449672, %v929_v32  ;;  %v922_v43 = vmul.f32 %v1431_v4, %v918_v40  ;;  %v1441_v53 = vpop.eup %1440  ;;  %v2101_v32 = vpop.permute.xlu0 %1041  ;;  %v891_v40 = vsel %vm887_vm3, 1.0, %v2234_v10 }
 0x657   :  { %v936_v35 = vmul.f32 %v1427_v59, %v932_v56  ;;  %v923_v27 = vmul.f32 %v1433_v49, %v919_v0  ;;  %v2085_v62 = vpop.permute.xlu1 %1097  ;;  %v2235_v0 = vld [vmem:[#allocation12_spill] sm:$0xff] }
 0x658   :  { %v937_v41 = vmul.f32 %v1429_v54, %v933_v30  ;;  %v926_v29 = vadd.f32 1.4214138, %v922_v43 }
 0x659   :  { %v940_v7 = vadd.f32 0.2548296, %v936_v35  ;;  %v927_v50 = vadd.f32 1.4214138, %v923_v27 }
 0x65a   :  { %v941_v33 = vadd.f32 0.2548296, %v937_v41  ;;  %v930_v42 = vmul.f32 %v1431_v4, %v926_v29  ;;  %v878_v29 = vmul.f32 0.5, %v2063_v58 }
 0x65b   :  { %v944_v20 = vmul.f32 %v1427_v59, %v940_v7  ;;  %v931_v2 = vmul.f32 %v1433_v49, %v927_v50 }
 0x65c   :  { %v945_v52 = vmul.f32 %v1429_v54, %v941_v33  ;;  %v934_v26 = vadd.f32 -0.28449672, %v930_v42  ;;  %v2092_v36 = vpop.permute.xlu1 %1111  ;;  %v889_v54 = vsel %vm885_vm1, 1.0, %v2234_v10 }
 0x65d   :  { %v964_v39 = vmul.f32 %v1435_v8, %v944_v20  ;;  %v935_v28 = vadd.f32 -0.28449672, %v931_v2  ;;  %v879_v8 = vmul.f32 0.5, %v2065_v57 }
 0x65e   :  { %v965_v15 = vmul.f32 %v1437_v24, %v945_v52  ;;  %v938_v31 = vmul.f32 %v1431_v4, %v934_v26  ;;  %v1084_v24 = vpop.permute.xlu0 %1083 }
 0x65f   :  { %v968_v6 = vsub.f32 1.0, %v964_v39  ;;  %v939_v9 = vmul.f32 %v1433_v49, %v935_v28  ;;  %v2236_v28 = vld [vmem:[#allocation14_spill] sm:$0xff] }
 0x660   :  { %v969_v59 = vsub.f32 1.0, %v965_v15  ;;  %v942_v13 = vadd.f32 0.2548296, %v938_v31 }
 0x661   :  { %v972_v11 = vmul.f32 %v968_v6, %v888_v16  ;;  %v943_v51 = vadd.f32 0.2548296, %v939_v9  ;;  %v1140_v56 = vpop.permute.xlu1 %1139 }
 0x662   :  { %v973_v38 = vmul.f32 %v969_v59, %v889_v54  ;;  %v946_v12 = vmul.f32 %v1431_v4, %v942_v13  ;;  %v890_v4 = vsel %vm886_vm2, 1.0, %v2234_v10  ;;  %v2238_v10 = vld [vmem:[#allocation11_spill] sm:$0xff] }
 0x663   :  { %v976_v60 = vadd.f32 1.0, %v972_v11  ;;  %v947_v5 = vmul.f32 %v1433_v49, %v943_v51 }
 0x664   :  { %v977_v46 = vadd.f32 1.0, %v973_v38  ;;  %v966_v22 = vmul.f32 %v1439_v17, %v946_v12 }
 0x665   :  { %v2099_v3 = vmul.f32 %v976_v60, %v876_v63  ;;  %v967_v1 = vmul.f32 %v1441_v53, %v947_v5 }
 0x666   :  { %v2103_v61 = vmul.f32 %v977_v46, %v877_v14  ;;  %v970_v44 = vsub.f32 1.0, %v966_v22  ;;  %v1154_v31 = vpop.permute.xlu1 %1153  ;;  %v1126_v22 = vpop.permute.xlu0 %1125 }
 0x667   :  { %v971_v45 = vsub.f32 1.0, %v967_v1  ;;  %v991_v49 = vrot.slane %v2099_v3, %v1619_v21  ;;  %v1019_v23 = vrot.slane %v2099_v3, %v1624_v25  ;;  %v1033_v30 = vrot.slane %v2099_v3, %v2235_v0 }
 0x668   :  { %v974_v43 = vmul.f32 %v970_v44, %v890_v4  ;;  %v995_v35 = vrot.slane %v2103_v61, %v1619_v21  ;;  %v1023_v27 = vrot.slane %v2103_v61, %v1624_v25  ;;  %v1037_v41 = vrot.slane %v2103_v61, %v2235_v0  ;;  %v2239_v44 = vld [vmem:[#allocation13_spill] sm:$0xff] }
 0x669   :  { %v975_v7 = vmul.f32 %v971_v45, %v891_v40  ;;  %v1024_v50 = vmul.f32 %v1019_v23, %v2077_v47  ;;  %v1038_v20 = vmul.f32 %v1033_v30, %v2079_v18  ;;  %v996_v26 = vmul.f32 %v991_v49, %v2074_v37 }
 0x66a   :  { %v978_v33 = vadd.f32 1.0, %v974_v43  ;;  %v1025_v42 = vmul.f32 %v1023_v27, %v2077_v47  ;;  %v1039_v2 = vmul.f32 %v1037_v41, %v2079_v18  ;;  %v997_v58 = vmul.f32 %v995_v35, %v2074_v37  ;;  %v2237_v18 = vld [vmem:[#allocation15_spill] sm:$0xff] }
 0x66b   :  { %v979_v52 = vadd.f32 1.0, %v975_v7  ;;  %v1061_v15 = vrot.slane %v2099_v3, %v2236_v28  ;;  %v1065_v47 = vrot.slane %v2103_v61, %v2236_v28  ;;  %v1075_v57 = vrot.slane %v2099_v3, %v2237_v18  ;;  %v1182_v49 = vpop.permute.xlu1 %1181 }
 0x66c   :  { %v2126_v39 = vmul.f32 %v978_v33, %v878_v29  ;;  %v1079_v9 = vrot.slane %v2103_v61, %v2237_v18  ;;  %v1005_v16 = vrot.slane %v2099_v3, %v2238_v10  ;;  %v1210_v59 = vadd.f32 %v1038_v20, %v1024_v50 }
 0x66d   :  { %v2133_v6 = vmul.f32 %v979_v52, %v879_v8  ;;  %v2141_v37 = vadd.f32 %v1039_v2, %v1025_v42  ;;  %v1009_v63 = vrot.slane %v2103_v61, %v2238_v10  ;;  %v1066_v12 = vmul.f32 %v1061_v15, %v2081_v55 }
 0x66e   :  { %v1103_v13 = vrot.slane %v2126_v39, %v1619_v21  ;;  %v1117_v54 = vrot.slane %v2126_v39, %v2238_v10  ;;  %v1010_v38 = vmul.f32 %v1005_v16, %v2089_v19  ;;  %v1145_v5 = vrot.slane %v2126_v39, %v2235_v0 }
 0x66f   :  { %v1107_v11 = vrot.slane %v2133_v6, %v1619_v21  ;;  %v1121_v51 = vrot.slane %v2133_v6, %v2238_v10  ;;  %v1067_v53 = vmul.f32 %v1065_v47, %v2081_v55  ;;  %v1080_v21 = vmul.f32 %v1075_v57, %v2083_v48 }
 0x670   :  { %v1108_v17 = vmul.f32 %v1103_v13, %v2085_v62  ;;  %v1122_v60 = vmul.f32 %v1117_v54, %v2092_v36  ;;  %v1081_v14 = vmul.f32 %v1079_v9, %v2083_v48  ;;  %v1149_v46 = vrot.slane %v2133_v6, %v2235_v0 }
 0x671   :  { %v1109_v1 = vmul.f32 %v1107_v11, %v2085_v62  ;;  %v1123_v4 = vmul.f32 %v1121_v51, %v2092_v36  ;;  %v1011_v40 = vmul.f32 %v1009_v63, %v2089_v19  ;;  %v1047_v45 = vrot.slane %v2099_v3, %v2239_v44  ;;  %v2240_v36 = vld [vmem:[#allocation16_spill] sm:$0xff] }
 0x672   :  { %v1216_v23 = vadd.f32 %v1122_v60, %v1108_v17  ;;  %v1208_v55 = vadd.f32 %v1010_v38, %v996_v26  ;;  %v1150_v30 = vmul.f32 %v1145_v5, %v1140_v56  ;;  %v1051_v48 = vrot.slane %v2103_v61, %v2239_v44 }
 0x673   :  { %v1052_v43 = vmul.f32 %v1047_v45, %v2101_v32  ;;  %v1159_v0 = vrot.slane %v2126_v39, %v2239_v44  ;;  %v1163_v62 = vrot.slane %v2133_v6, %v2239_v44  ;;  %v1089_v19 = vrot.slane %v2099_v3, %v2240_v36  ;;  %v1168_v3 = vpop.permute.xlu0 %1167 }
 0x674   :  { %v1151_v35 = vmul.f32 %v1149_v46, %v1140_v56  ;;  %v1053_v27 = vmul.f32 %v1051_v48, %v2101_v32  ;;  %v1093_v41 = vrot.slane %v2103_v61, %v2240_v36  ;;  %v1187_v29 = vrot.slane %v2126_v39, %v2237_v18 }
 0x675   :  { %v1217_v7 = vadd.f32 %v1123_v4, %v1109_v1  ;;  %v1209_v50 = vadd.f32 %v1011_v40, %v997_v58  ;;  %v1212_v33 = vadd.f32 %v1066_v12, %v1052_v43  ;;  %v1094_v42 = vmul.f32 %v1089_v19, %v1084_v24  ;;  %v1196_v58 = vpop.permute.xlu1 %1195 }
 0x676   :  { %v1164_v20 = vmul.f32 %v1159_v0, %v1154_v31  ;;  %v1165_v2 = vmul.f32 %v1163_v62, %v1154_v31  ;;  %v1095_v8 = vmul.f32 %v1093_v41, %v1084_v24  ;;  %v1191_v52 = vrot.slane %v2133_v6, %v2237_v18 }
 0x677   :  { %v1213_v56 = vadd.f32 %v1067_v53, %v1053_v27  ;;  %v1131_v32 = vrot.slane %v2126_v39, %v1624_v25  ;;  %v1135_v61 = vrot.slane %v2133_v6, %v1624_v25  ;;  %v1173_v26 = vrot.slane %v2126_v39, %v2236_v28 }
 0x678   :  { %v1214_v15 = vadd.f32 %v1094_v42, %v1080_v21  ;;  %v1192_v47 = vmul.f32 %v1187_v29, %v1182_v49  ;;  %v1177_v24 = vrot.slane %v2133_v6, %v2236_v28  ;;  %v1201_v31 = vrot.slane %v2126_v39, %v2240_v36 }
 0x679   :  { %v1215_v18 = vadd.f32 %v1095_v8, %v1081_v14  ;;  %v1136_v57 = vmul.f32 %v1131_v32, %v1126_v22  ;;  %v1137_v9 = vmul.f32 %v1135_v61, %v1126_v22  ;;  %v1178_v10 = vmul.f32 %v1173_v26, %v1168_v3 }
 0x67a   :  { %v1193_v16 = vmul.f32 %v1191_v52, %v1182_v49  ;;  %v1179_v13 = vmul.f32 %v1177_v24, %v1168_v3  ;;  %v1205_v25 = vrot.slane %v2133_v6, %v2240_v36  ;;  %v1206_v54 = vmul.f32 %v1201_v31, %v1196_v58  ;;  %v1447_v52 = vld [vmem:[#allocation5 + $0x8] sm:$0xff] }
 0x67b   :  { %v1224_v11 = vadd.f32 %v1210_v59, %v1208_v55  ;;  %v1218_v51 = vadd.f32 %v1150_v30, %v1136_v57  ;;  %v1219_v63 = vadd.f32 %v1151_v35, %v1137_v9  ;;  %v1220_v38 = vadd.f32 %v1178_v10, %v1164_v20 }
 0x67c   :  { %v1226_v12 = vadd.f32 %v1214_v15, %v1212_v33  ;;  %v1221_v17 = vadd.f32 %v1179_v13, %v1165_v2  ;;  %v1207_v28 = vmul.f32 %v1205_v25, %v1196_v58  ;;  %v1222_v60 = vadd.f32 %v1206_v54, %v1192_v47  ;;  %v1446_v2 = vld [vmem:[#allocation5] sm:$0xff] }
 0x67d   :  { %v1225_v39 = vadd.f32 %v2141_v37, %v1209_v50  ;;  %v1228_v5 = vadd.f32 %v1218_v51, %v1216_v23  ;;  %v1227_v53 = vadd.f32 %v1215_v18, %v1213_v56  ;;  %v1229_v21 = vadd.f32 %v1219_v63, %v1217_v7 }
 0x67e   :  { %v1223_v14 = vadd.f32 %v1207_v28, %v1193_v16  ;;  %v1230_v46 = vadd.f32 %v1222_v60, %v1220_v38  ;;  %v1232_v1 = vadd.f32 %v1226_v12, %v1224_v11  ;;  %v1565_v0 = vmov 37  }
 0x67f   :  { %v1233_v6 = vadd.f32 %v1227_v53, %v1225_v39  ;;  %1399 = vset.pattern.permute.xlu0 %v1565_v0  ;;  %v1566_v62 = vmov 38  }
 0x680   :  { %v1231_v22 = vadd.f32 %v1223_v14, %v1221_v17  ;;  %v1234_v4 = vadd.f32 %v1230_v46, %v1228_v5  ;;  %1400 = vset.pattern.permute.xlu1 %v1566_v62 }
 0x682   :  { %v1235_v40 = vadd.f32 %v1231_v22, %v1229_v21  ;;  %v1236_v59 = vadd.f32 %v1234_v4, %v1232_v1 }
 0x684   :  { %v1237_v44 = vadd.f32 %v1235_v40, %v1233_v6 }
 0x686   :  { %v1238_v45 = vadd.f32 %v1237_v44, %v1236_v59 }
 0x688   :  { %1239 = vadd.xlane.f32.xlu0 %v1238_v45 }
 0x711   :  { %v1240_v49 = vpop.xlane.xlu0 %1239 }
 0x712   :  { %v1241_v55 = vmul.f32 0.00390625, %v1240_v49 }
 0x714   :  { %v1242_v30 = vsub.f32 %v1236_v59, %v1241_v55  ;;  %v1243_v48 = vsub.f32 %v1237_v44, %v1241_v55 }
 0x716   :  { %v1244_v43 = vmul.f32 %v1242_v30, %v1242_v30  ;;  %v1245_v37 = vmul.f32 %v1243_v48, %v1243_v48 }
 0x718   :  { %v1246_v23 = vadd.f32 %v1245_v37, %v1244_v43 }
 0x71a   :  { %1247 = vadd.xlane.f32.xlu1 %v1246_v23 }
 0x72b   :  { %1261 = vperm.xlu1 %1400, %v2014_v34  }
 0x7a3   :  { %v1248_v36 = vpop.xlane.xlu1 %1247 }
 0x7a4   :  { %v1249_v19 = vmul.f32 0.00390625, %v1248_v36 }
 0x7a6   :  { %v1250_v35 = vadd.f32 1e-05, %v1249_v19 }
 0x7a7   :  { %v1262_v7 = vpop.permute.xlu1 %1261 }
 0x7a8   :  { %1442 = vrsqrt.f32 %v1250_v35 }
 0x7b5   :  { %v1443_v27 = vpop.eup %1442 }
 0x7b6   :  { %v1252_v41 = vmul.f32 %v2014_v34, %v1443_v27 }
 0x7b8   :  { %1255 = vperm.xlu0 %1399, %v1252_v41  }
 0x7bc   :  { %1401 = vset.pattern.permute.xlu0 %v1566_v62 }
 0x833   :  { %v1256_v29 = vpop.permute.xlu0 %1255 }
 0x834   :  { %v1258_v50 = vmul.f32 %v1256_v29, %v1242_v30  ;;  %v1259_v33 = vmul.f32 %v1256_v29, %v1243_v48 }
 0x836   :  { %v1264_v42 = vadd.f32 %v1262_v7, %v1258_v50  ;;  %v1265_v20 = vadd.f32 %v1262_v7, %v1259_v33 }
 0x838   :  { %v1266_v8 = vadd.f32 %v1446_v2, %v1264_v42  ;;  %v1267_v3 = vadd.f32 %v1447_v52, %v1265_v20 }
 0x83a   :  { %1268 = vst [vmem:[#allocation7] sm:$0xff] %v1266_v8  ;;  %1269 = vst [vmem:[#allocation7 + $0x8] sm:$0xff] %v1267_v3 }
 0x83b   :  { %1499 = shalt.err (!%p1496_p0)
}
 0x83c   :  { %1279 = dma.vmem_to_hbm [thread:$0]  %s1277_s30, 256, %s2205_s2, [#allocation4]  }
 0x83d   :  { %1512 = dma.done.wait [#allocation4], 256  }
 0x83e   :  { %1513 = vsyncadd [#allocation4], 4294967040 }
 0x83f   :  { %1283 = vsyncpa [#allocation3], 1 }
 0x840   :  { %1284 = vsyncpa [#allocation6], 1 }
 0x841   :  { %1285 = vsyncpa [#allocation4], 1 }

</bundles_post_ra>
